<compile_context>
chip_gen: v7x
topology: tpu7x:2x2x1
jax: 0.10.0
libtpu: 0.0.40
codegen_flags: <defaults>
</compile_context>

<pallas_src>
import numpy as np
import jax
import jax.numpy as jnp
from jax import lax
from jax.experimental import pallas as pl
from jax.experimental.pallas import tpu as pltpu


# ---------------------------------------------------------------------------
# Parameter init (plain JAX "glue"): xavier_uniform + one power-iteration
# spectral norm, matching spectral_init(nn.Conv1d(..., 1), gain).
# ---------------------------------------------------------------------------
def _xavier_uniform(key, out_c, in_c, gain):
    fan_in, fan_out = in_c, out_c  # kernel_size == 1
    bound = gain * np.sqrt(6.0 / (fan_in + fan_out))
    return jax.random.uniform(key, (out_c, in_c), jnp.float32, -bound, bound)


def _spectral_norm_weight(w_key, u_key, out_c, in_c, gain):
    w = _xavier_uniform(w_key, out_c, in_c, gain)          # (out_c, in_c)
    u = jax.random.normal(u_key, (out_c,), jnp.float32)    # weight_u buffer
    v = w.T @ u
    v = v / jnp.linalg.norm(v)
    u = w @ v
    u = u / jnp.linalg.norm(u)
    sigma = u @ w @ v
    return w / sigma


# ---------------------------------------------------------------------------
# Generation-aware hardware queries (fall back to safe defaults).
# ---------------------------------------------------------------------------
def _vmem_capacity_bytes():
    try:
        cap = int(pltpu.get_tpu_info().vmem_capacity_bytes)
        if cap > 0:
            return cap
    except Exception:
        pass
    try:
        dk = jax.devices()[0].device_kind.lower()
    except Exception:
        dk = ""
    return (64 << 20) if "v7" in dk else (128 << 20)


def _has_bf16_vector_units():
    # bf16 VPU/EUP exists on v6e (Trillium) and v7x; v5e and older lack it.
    try:
        dk = jax.devices()[0].device_kind.lower()
    except Exception:
        return False
    return ("v6" in dk) or ("v7" in dk) or ("trillium" in dk)


# ---------------------------------------------------------------------------
# VMEM budgeting / column-tile selection.
# ---------------------------------------------------------------------------
def _estimate_vmem_bytes(c, c8, n, tn, attn_itemsize, return_attn):
    f32, bf16 = 4, 2
    weights = 2 * ((c8 + c) * c + c8 * c) * bf16            # double-buffered inputs
    x_block = 2 * c * n * f32                               # resident per batch
    out_block = 2 * c * tn * f32
    attn_block = (2 * n * tn * attn_itemsize) if return_attn else 0
    scratch = (max(c8, 16) * n + c * n) * bf16              # q / v caches (packed)
    interm = n * tn * (f32 + f32 + bf16)                    # qk / e / attn temporaries
    return weights + x_block + out_block + attn_block + scratch + interm


def _pick_tn(c, c8, n, attn_itemsize, return_attn, budget):
    cands = [t for t in (1024, 512, 256, 128) if t <= n and n % t == 0]
    if not cands:
        return n
    for tn in cands:
        if _estimate_vmem_bytes(c, c8, n, tn, attn_itemsize, return_attn) <= budget:
            return tn
    return cands[-1]


# ---------------------------------------------------------------------------
# Pallas kernel: one (batch, column-tile) pair per grid step.
# ---------------------------------------------------------------------------
def _make_kernel(c8, exp_in_bf16, return_attn):
    def kernel(x_ref, wqv_ref, wk_ref, gamma_ref, *rest):
        if return_attn:
            out_ref, attn_ref, q_scr, v_scr = rest
        else:
            out_ref, q_scr, v_scr = rest
            attn_ref = None

        j = pl.program_id(1)
        tn = out_ref.shape[-1]

        # ----- per-batch setup: fused q/v projection, cached in VMEM -----
        @pl.when(j == 0)
        def _():
            x_bf = x_ref[0].astype(jnp.bfloat16)                       # (C, N)
            qv = jnp.dot(wqv_ref[...], x_bf,
                         preferred_element_type=jnp.float32)           # (C8+C, N)
            q_scr[...] = qv[:c8].astype(jnp.bfloat16)                  # (C8, N)
            v_scr[...] = qv[c8:].astype(jnp.bfloat16)                  # (C, N)

        # ----- per column tile -----
        col0 = pl.multiple_of(j * tn, tn)
        x_tile = x_ref[0, :, pl.ds(col0, tn)]                          # (C, TN) f32

        k_tile = jnp.dot(wk_ref[...], x_tile.astype(jnp.bfloat16),
                         preferred_element_type=jnp.float32
                         ).astype(jnp.bfloat16)                        # (C8, TN)

        # qk_tile = q^T @ k_tile (contract dim 0 of q against dim 0 of k).
        qk = lax.dot_general(q_scr[...], k_tile,
                             dimension_numbers=(((0,), (0,)), ((), ())),
                             preferred_element_type=jnp.float32)       # (N, TN)

        # F.softmax(query_key, dim=1): softmax over the row axis, per column.
        m = jnp.max(qk, axis=0, keepdims=True)                         # (1, TN) f32
        z = qk - m
        e = jnp.exp(z.astype(jnp.bfloat16)) if exp_in_bf16 else jnp.exp(z)
        s = jnp.sum(e, axis=0, keepdims=True, dtype=jnp.float32)       # (1, TN) f32
        inv_s = pl.reciprocal(s, approx=False)      # exact; only a (1, TN) vector

        if return_attn:
            if attn_ref.dtype == jnp.bfloat16:
                # single normalize(+cast) pass, reused for store AND matmul
                attn_mm = (e * inv_s.astype(e.dtype)).astype(jnp.bfloat16)
                attn_ref[0] = attn_mm
            else:
                attn_f = e.astype(jnp.float32) * inv_s
                attn_ref[0] = attn_f.astype(attn_ref.dtype)
                attn_mm = attn_f.astype(jnp.bfloat16)
            out_tile = jnp.dot(v_scr[...], attn_mm,
                               preferred_element_type=jnp.float32)     # (C, TN)
        else:
            # No attention-map output: skip normalizing the (N, TN) tile and
            # rescale the small (C, TN) matmul result instead.
            e_mm = e if e.dtype == jnp.bfloat16 else e.astype(jnp.bfloat16)
            out_tile = jnp.dot(v_scr[...], e_mm,
                               preferred_element_type=jnp.float32) * inv_s

        gamma = gamma_ref[0, 0]
        out_ref[0] = gamma * out_tile + x_tile

    return kernel


# ---------------------------------------------------------------------------
# Wrapper: layout prep, BlockSpecs, grid, generation-aware tuning.
# ---------------------------------------------------------------------------
def self_attention_forward(x_nchw, wq, wk, wv, gamma, *, tn=None,
                           attn_dtype=jnp.bfloat16, return_attn=True):
    B, C, H, W = x_nchw.shape
    N = H * W
    C8 = wq.shape[0]
    assert wq.shape == (C8, C) and wk.shape == (C8, C) and wv.shape == (C, C)

    attn_itemsize = jnp.dtype(attn_dtype).itemsize
    vmem_budget = int(0.85 * _vmem_capacity_bytes())   # v7x-safe (64 MiB chips)

    if tn is None:
        tn = _pick_tn(C, C8, N, attn_itemsize, return_attn, vmem_budget)
    assert N % tn == 0, "column tile must divide N = H*W"
    nj = N // tn

    x = x_nchw.reshape(B, C, N).astype(jnp.float32)
    wqv_b = jnp.concatenate([wq, wv], axis=0).astype(jnp.bfloat16)   # (C8+C, C)
    wk_b = wk.astype(jnp.bfloat16)
    gamma_arr = jnp.asarray(gamma, jnp.float32).reshape(1, 1)

    exp_in_bf16 = _has_bf16_vector_units()   # bf16 exp only where EUP supports it
    kernel = _make_kernel(C8, exp_in_bf16, return_attn)

    out_shapes = [jax.ShapeDtypeStruct((B, C, N), jnp.float32)]
    out_specs = [pl.BlockSpec((1, C, tn), lambda b, j: (b, 0, j))]
    if return_attn:
        out_shapes.append(jax.ShapeDtypeStruct((B, N, N), attn_dtype))
        out_specs.append(pl.BlockSpec((1, N, tn), lambda b, j: (b, 0, j)))

    weight_bytes = (wqv_b.size + wk_b.size) * 2
    cost = pl.CostEstimate(
        flops=int(2 * B * N * (C * (2 * C8 + C) + N * (C8 + C))),
        transcendentals=int(B * N * N),
        bytes_accessed=int(2 * B * C * N * 4 + B * weight_bytes
                           + (B * N * N * attn_itemsize if return_attn else 0)),
    )

    results = pl.pallas_call(
        kernel,
        out_shape=tuple(out_shapes),
        grid_spec=pltpu.PrefetchScalarGridSpec(
            num_scalar_prefetch=0,
            grid=(B, nj),
            in_specs=[
                # x resident per batch (same block across the column axis)
                pl.BlockSpec((1, C, N), lambda b, j: (b, 0, 0)),
                pl.BlockSpec((C8 + C, C), lambda b, j: (0, 0)),   # [Wq; Wv]
                pl.BlockSpec((C8, C), lambda b, j: (0, 0)),       # Wk
                pl.BlockSpec((1, 1), lambda b, j: (0, 0),
                             memory_space=pltpu.SMEM),            # gamma
            ],
            out_specs=tuple(out_specs),
            scratch_shapes=[
                pltpu.VMEM((C8, N), jnp.bfloat16),   # q, cached per batch
                pltpu.VMEM((C, N), jnp.bfloat16),    # v, cached per batch
            ],
        ),
        compiler_params=pltpu.CompilerParams(
            # TODO(synk): for B == 1 on v7x (2 TensorCores), split the column
            # axis across cores (redundant q/v projection per core) so one TC
            # is not left idle.
            dimension_semantics=("parallel", "arbitrary"),
            vmem_limit_bytes=vmem_budget,
        ),
        cost_estimate=cost,
    )(x, wqv_b, wk_b, gamma_arr)

    out = results[0].reshape(B, C, H, W)
    if return_attn:
        return out, results[1]
    return out, None


# ---------------------------------------------------------------------------
# Pure-JAX f32 reference (mirrors the PyTorch forward) for correctness check.
# ---------------------------------------------------------------------------
def self_attention_ref(x_nchw, wq, wk, wv, gamma):
    B, C, H, W = x_nchw.shape
    x = x_nchw.reshape(B, C, -1)                      # (B, C, N)
    q = jnp.einsum('oc,bcn->bon', wq, x)              # (B, C8, N)
    k = jnp.einsum('oc,bcn->bon', wk, x)              # (B, C8, N)
    v = jnp.einsum('oc,bcn->bon', wv, x)              # (B, C, N)
    qk = jnp.einsum('bdi,bdj->bij', q, k)             # (B, N, N)
    attn = jax.nn.softmax(qk, axis=1)
    out = jnp.einsum('bcn,bnm->bcm', v, attn)
    out = gamma * out + x
    return out.reshape(B, C, H, W), attn


if __name__ == "__main__":
    # in_channel must be >= 8 (in_channel // 8 >= 1); N = H*W is lane-dense.
    B, C, H, W = 2, 64, 16, 16
    gain = 2.0 ** 0.5

    key = jax.random.PRNGKey(0)
    kx, kwq, kwk, kwv, kuq, kuk, kuv = jax.random.split(key, 7)

    x = jax.random.normal(kx, (B, C, H, W), jnp.float32)
    wq = _spectral_norm_weight(kwq, kuq, C // 8, C, gain)   # (C//8, C)
    wk = _spectral_norm_weight(kwk, kuk, C // 8, C, gain)   # (C//8, C)
    wv = _spectral_norm_weight(kwv, kuv, C, C, gain)        # (C, C)
    # Module initializes gamma to 0 (residual-only); use a nonzero value here so
    # the attention path is actually exercised by the numerical check.
    gamma = jnp.float32(0.5)

    # tn=128 so the test exercises multiple column tiles per batch (N=256).
    out, attn = self_attention_forward(x, wq, wk, wv, gamma, tn=128)
    out = jax.block_until_ready(out)
    attn = jax.block_until_ready(attn)

    out_ref, attn_ref = self_attention_ref(x, wq, wk, wv, gamma)

    # bf16 MXU operands / bf16 attention map -> relaxed tolerance vs f32 ref.
    attn_f32 = np.asarray(attn).astype(np.float32)
    assert np.allclose(attn_f32, np.asarray(attn_ref),
                       rtol=5e-2, atol=5e-2), "attention map mismatch"
    assert np.allclose(np.asarray(out), np.asarray(out_ref),
                       rtol=5e-2, atol=5e-2), "output mismatch"
    # Softmax-axis sanity: columns of the attention map sum to 1.
    assert np.allclose(attn_f32.sum(axis=1), 1.0, atol=1e-2)

    # Out-only path: attention map dropped -> no N^2 writeback at all.
    out2, attn2 = self_attention_forward(x, wq, wk, wv, gamma, tn=128,
                                         return_attn=False)
    out2 = jax.block_until_ready(out2)
    assert attn2 is None
    assert np.allclose(np.asarray(out2), np.asarray(out_ref),
                       rtol=5e-2, atol=5e-2), "out-only output mismatch"

    print("KERNEL_OK")
</pallas_src>

<mosaic_0001>
module attributes {stable_mosaic.version = 11 : i64} {
  func.func @kernel(%arg0: i32, %arg1: i32, %arg2: memref<1x64x256xf32, #tpu.memory_space<vmem>>, %arg3: memref<72x64xbf16, #tpu.memory_space<vmem>>, %arg4: memref<8x64xbf16, #tpu.memory_space<vmem>>, %arg5: memref<1x1xf32, #tpu.memory_space<smem>>, %arg6: memref<1x64x128xf32, #tpu.memory_space<vmem>>, %arg7: memref<1x256x128xbf16, #tpu.memory_space<vmem>>, %arg8: memref<8x256xbf16, #tpu.memory_space<vmem>>, %arg9: memref<64x256xbf16, #tpu.memory_space<vmem>>) attributes {dimension_semantics = [#tpu.dimension_semantics<parallel>, #tpu.dimension_semantics<arbitrary>], iteration_bounds = array<i64: 2, 2>, scalar_prefetch = 0 : i64, scratch_operands = 2 : i64, tpu.core_type = #tpu.core_type<tc>, window_params = [{transform_indices = @transform_0, window_bounds = array<i64: 1, 64, 256>}, {pipeline_mode = #tpu.pipeline_mode<synchronous>, transform_indices = @transform_1, window_bounds = array<i64: 72, 64>}, {pipeline_mode = #tpu.pipeline_mode<synchronous>, transform_indices = @transform_2, window_bounds = array<i64: 8, 64>}, {transform_indices = @transform_3, window_bounds = array<i64: 1, 1>}, {transform_indices = @transform_4, window_bounds = array<i64: 1, 64, 128>}, {transform_indices = @transform_5, window_bounds = array<i64: 1, 256, 128>}]} {
    %c0_i32 = arith.constant 0 : i32
    %0 = arith.cmpi eq, %arg1, %c0_i32 : i32
    %1 = arith.extui %0 : i1 to i32
    %c0_i32_0 = arith.constant 0 : i32
    %2 = arith.cmpi ne, %1, %c0_i32_0 : i32
    scf.if %2 {
      %c0_20 = arith.constant 0 : index
      %c0_21 = arith.constant 0 : index
      %c0_22 = arith.constant 0 : index
      %37 = vector.load %arg2[%c0_20, %c0_21, %c0_22] : memref<1x64x256xf32, #tpu.memory_space<vmem>>, vector<1x64x256xf32>
      %38 = vector.shape_cast %37 : vector<1x64x256xf32> to vector<64x256xf32>
      %39 = arith.truncf %38 : vector<64x256xf32> to vector<64x256xbf16>
      %c0_23 = arith.constant 0 : index
      %c0_24 = arith.constant 0 : index
      %40 = vector.load %arg3[%c0_23, %c0_24] : memref<72x64xbf16, #tpu.memory_space<vmem>>, vector<72x64xbf16>
      %cst_25 = arith.constant dense<0.000000e+00> : vector<72x256xf32>
      %41 = tpu.matmul %40, %39, %cst_25 {dimension_numbers = #tpu.dot_dimension_numbers<[1], [0], [0], [1], [0, 0, 1, 1], [], []>} : vector<72x64xbf16>, vector<64x256xbf16>, vector<72x256xf32> -> vector<72x256xf32>
      %42 = vector.extract_strided_slice %41 {offsets = [0, 0], sizes = [8, 256], strides = [1, 1]} : vector<72x256xf32> to vector<8x256xf32>
      %43 = arith.truncf %42 : vector<8x256xf32> to vector<8x256xbf16>
      %c0_26 = arith.constant 0 : index
      %c0_27 = arith.constant 0 : index
      %44 = vector.load %arg8[%c0_26, %c0_27] : memref<8x256xbf16, #tpu.memory_space<vmem>>, vector<8x256xbf16>
      tpu.vector_store %arg8[%c0_26, %c0_27], %43 {strides = array<i32>} : memref<8x256xbf16, #tpu.memory_space<vmem>>, vector<8x256xbf16>,
      %45 = vector.extract_strided_slice %41 {offsets = [8, 0], sizes = [64, 256], strides = [1, 1]} : vector<72x256xf32> to vector<64x256xf32>
      %46 = arith.truncf %45 : vector<64x256xf32> to vector<64x256xbf16>
      %c0_28 = arith.constant 0 : index
      %c0_29 = arith.constant 0 : index
      %47 = vector.load %arg9[%c0_28, %c0_29] : memref<64x256xbf16, #tpu.memory_space<vmem>>, vector<64x256xbf16>
      tpu.vector_store %arg9[%c0_28, %c0_29], %46 {strides = array<i32>} : memref<64x256xbf16, #tpu.memory_space<vmem>>, vector<64x256xbf16>,
    } else {
    }
    %c128_i32 = arith.constant 128 : i32
    %3 = arith.muli %arg1, %c128_i32 : i32
    %4 = tpu.assume_multiple %3, 128 : i32
    %c0 = arith.constant 0 : index
    %c0_1 = arith.constant 0 : index
    %5 = arith.index_cast %4 : i32 to index
    %6 = vector.load %arg2[%c0, %c0_1, %5] : memref<1x64x256xf32, #tpu.memory_space<vmem>>, vector<1x64x128xf32>
    %7 = vector.shape_cast %6 : vector<1x64x128xf32> to vector<64x128xf32>
    %c0_2 = arith.constant 0 : index
    %c0_3 = arith.constant 0 : index
    %8 = vector.load %arg4[%c0_2, %c0_3] : memref<8x64xbf16, #tpu.memory_space<vmem>>, vector<8x64xbf16>
    %9 = arith.truncf %7 : vector<64x128xf32> to vector<64x128xbf16>
    %cst = arith.constant dense<0.000000e+00> : vector<8x128xf32>
    %10 = tpu.matmul %8, %9, %cst {dimension_numbers = #tpu.dot_dimension_numbers<[1], [0], [0], [1], [0, 0, 1, 1], [], []>} : vector<8x64xbf16>, vector<64x128xbf16>, vector<8x128xf32> -> vector<8x128xf32>
    %11 = arith.truncf %10 : vector<8x128xf32> to vector<8x128xbf16>
    %c0_4 = arith.constant 0 : index
    %c0_5 = arith.constant 0 : index
    %12 = vector.load %arg8[%c0_4, %c0_5] : memref<8x256xbf16, #tpu.memory_space<vmem>>, vector<8x256xbf16>
    %cst_6 = arith.constant dense<0.000000e+00> : vector<256x128xf32>
    %13 = tpu.matmul %12, %11, %cst_6 {dimension_numbers = #tpu.dot_dimension_numbers<[0], [0], [1], [1], [0, 1, 1, 1], [], []>} : vector<8x256xbf16>, vector<8x128xbf16>, vector<256x128xf32> -> vector<256x128xf32>
    %cst_7 = arith.constant dense<0xFF800000> : vector<128xf32>
    %14 = vector.multi_reduction <maximumf>, %13, %cst_7 [0] : vector<256x128xf32> to vector<128xf32>
    %15 = vector.shape_cast %14 : vector<128xf32> to vector<1x128xf32>
    %16 = vector.broadcast %15 : vector<1x128xf32> to vector<256x128xf32>
    %17 = arith.subf %13, %16 : vector<256x128xf32>
    %18 = math.exp %17 : vector<256x128xf32>
    %cst_8 = arith.constant dense<0.000000e+00> : vector<128xf32>
    %19 = vector.multi_reduction <add>, %18, %cst_8 [0] : vector<256x128xf32> to vector<128xf32>
    %20 = vector.shape_cast %19 : vector<128xf32> to vector<1x128xf32>
    %21 = tpu.reciprocal %20 : vector<1x128xf32> -> vector<1x128xf32>
    %22 = vector.broadcast %21 : vector<1x128xf32> to vector<256x128xf32>
    %23 = arith.mulf %18, %22 : vector<256x128xf32>
    %24 = arith.truncf %23 : vector<256x128xf32> to vector<256x128xbf16>
    %c0_9 = arith.constant 0 : index
    %c0_10 = arith.constant 0 : index
    %c0_11 = arith.constant 0 : index
    %25 = vector.load %arg7[%c0_9, %c0_10, %c0_11] : memref<1x256x128xbf16, #tpu.memory_space<vmem>>, vector<1x256x128xbf16>
    %26 = vector.shape_cast %25 : vector<1x256x128xbf16> to vector<256x128xbf16>
    %27 = vector.shape_cast %24 : vector<256x128xbf16> to vector<1x256x128xbf16>
    tpu.vector_store %arg7[%c0_9, %c0_10, %c0_11], %27 {strides = array<i32>} : memref<1x256x128xbf16, #tpu.memory_space<vmem>>, vector<1x256x128xbf16>,
    %c0_12 = arith.constant 0 : index
    %c0_13 = arith.constant 0 : index
    %28 = vector.load %arg9[%c0_12, %c0_13] : memref<64x256xbf16, #tpu.memory_space<vmem>>, vector<64x256xbf16>
    %cst_14 = arith.constant dense<0.000000e+00> : vector<64x128xf32>
    %29 = tpu.matmul %28, %24, %cst_14 {dimension_numbers = #tpu.dot_dimension_numbers<[1], [0], [0], [1], [0, 0, 1, 1], [], []>} : vector<64x256xbf16>, vector<256x128xbf16>, vector<64x128xf32> -> vector<64x128xf32>
    %c0_15 = arith.constant 0 : index
    %c0_16 = arith.constant 0 : index
    %30 = memref.load %arg5[%c0_15, %c0_16] : memref<1x1xf32, #tpu.memory_space<smem>>
    %31 = vector.broadcast %30 : f32 to vector<64x128xf32>
    %32 = arith.mulf %31, %29 : vector<64x128xf32>
    %33 = arith.addf %32, %7 : vector<64x128xf32>
    %c0_17 = arith.constant 0 : index
    %c0_18 = arith.constant 0 : index
    %c0_19 = arith.constant 0 : index
    %34 = vector.load %arg6[%c0_17, %c0_18, %c0_19] : memref<1x64x128xf32, #tpu.memory_space<vmem>>, vector<1x64x128xf32>
    %35 = vector.shape_cast %34 : vector<1x64x128xf32> to vector<64x128xf32>
    %36 = vector.shape_cast %33 : vector<64x128xf32> to vector<1x64x128xf32>
    tpu.vector_store %arg6[%c0_17, %c0_18, %c0_19], %36 {strides = array<i32>} : memref<1x64x128xf32, #tpu.memory_space<vmem>>, vector<1x64x128xf32>,
    return
  }
  func.func @transform_0(%arg0: i32, %arg1: i32) -> (i32, i32, i32) {
    %c0_i32 = arith.constant 0 : i32
    %c0_i32_0 = arith.constant 0 : i32
    %c0_i32_1 = arith.constant 0 : i32
    return %arg0, %c0_i32, %c0_i32_0 : i32, i32, i32
  }
  func.func @transform_1(%arg0: i32, %arg1: i32) -> (i32, i32) {
    %c0_i32 = arith.constant 0 : i32
    %c0_i32_0 = arith.constant 0 : i32
    %c0_i32_1 = arith.constant 0 : i32
    return %c0_i32, %c0_i32_0 : i32, i32
  }
  func.func @transform_2(%arg0: i32, %arg1: i32) -> (i32, i32) {
    %c0_i32 = arith.constant 0 : i32
    %c0_i32_0 = arith.constant 0 : i32
    %c0_i32_1 = arith.constant 0 : i32
    return %c0_i32, %c0_i32_0 : i32, i32
  }
  func.func @transform_3(%arg0: i32, %arg1: i32) -> (i32, i32) {
    %c0_i32 = arith.constant 0 : i32
    %c0_i32_0 = arith.constant 0 : i32
    %c0_i32_1 = arith.constant 0 : i32
    return %c0_i32, %c0_i32_0 : i32, i32
  }
  func.func @transform_4(%arg0: i32, %arg1: i32) -> (i32, i32, i32) {
    %c0_i32 = arith.constant 0 : i32
    %c0_i32_0 = arith.constant 0 : i32
    return %arg0, %c0_i32, %arg1 : i32, i32, i32
  }
  func.func @transform_5(%arg0: i32, %arg1: i32) -> (i32, i32, i32) {
    %c0_i32 = arith.constant 0 : i32
    %c0_i32_0 = arith.constant 0 : i32
    return %arg0, %c0_i32, %arg1 : i32, i32, i32
  }
}

</mosaic_0001>

<bundles_post_ra>
// kernel: tpu_custom_call.1
= control target key start
LH: loop header
LB: loop body
LE: loop exit
PB: predicated region body
PF: predicated region fallthrough
CT: control target
= control target key end

     0   :  { %s3002_s0 = inlined_call_operand.hbm [shape: f32[2,64,256], index: 0, kind: input, shape index: {}]   ;;  %s3003_s1 = inlined_call_operand.hbm [shape: bf16[72,64], index: 1, kind: input, shape index: {}]   ;;  %s3004_s2 = inlined_call_operand.hbm [shape: bf16[8,64], index: 2, kind: input, shape index: {}]   ;;  %s3005_s3 = inlined_call_operand.<no memory space> [shape: f32[1,1], index: 3, kind: input, shape index: {}]   ;;  %s3006_s4 = inlined_call_operand.hbm [shape: f32[2,64,256], index: 4, kind: output, shape index: {0}]   ;;  %s3007_s5 = inlined_call_operand.hbm [shape: bf16[2,256,256], index: 5, kind: output, shape index: {1}]  }
   0x1   :  { %3018 = sst [smem:[#allocation22_spill]] %s3003_s1 }
   0x2   :  { %3019 = sst [smem:[#allocation23_spill]] %s3004_s2 }
   0x3   :  { %3020 = sst [smem:[#allocation24_spill]] %s3006_s4 }
   0x4   :  { %11 = sst [smem:[#allocation4]] %s3005_s3 }
   0x5   :  { %12 = vsyncpa [#allocation6], 0 }
   0x6   :  { %14 = vsyncpa [#allocation6 + $0x1], 0 }
   0x7   :  { %15 = vsyncpa [#allocation9], 0 }
   0x8   :  { %16 = vsyncpa [#allocation7], 0 }
   0x9   :  { %18 = vsyncpa [#allocation7 + $0x1], 0 }
   0xa   :  { %19 = vsyncpa [#allocation13], 0 }
   0xb   :  { %21 = vsyncpa [#allocation13 + $0x1], 0  ;;  %s2282_s20 = smov 0   ;;  %s2284_s21 = smov 0  }
   0xc   :  { %s2286_s22 = smov 0   ;;  %s2288_s23 = smov 0  }
   0xd   :  { %s2290_s24 = smov 0   ;;  %s2292_s25 = smov 0  }
   0xe   :  { %s2294_s3 = smov 0   ;;  %s2296_s26 = smov 0  }
   0xf   :  { %s2298_s27 = smov 0   ;;  %s2300_s28 = smov 0  }
  0x10   :  { %s2302_s29 = smov 0  }
  0x11 LB: > { %3021 = sst [smem:[#allocation18_spill]] %s2190_s20  ;;  %s1438_s30 = sadd.s32 4294967295, %s2230_s29   ;;  %s2230_s29 = sphi %s2302_s29, %s27_s29   ;;  %s2226_s28 = sphi %s2300_s28, %s3059_s28   ;;  %s2222_s27 = sphi %s2298_s27, %s3051_s27   ;;  %s2218_s26 = sphi %s2296_s26, %s3058_s26   ;;  %s2214_s3 = sphi %s2294_s3, %s3050_s3   ;;  %s2210_s25 = sphi %s2292_s25, %s3057_s25   ;;  %s2206_s24 = sphi %s2290_s24, %s3056_s24   ;;  %s2202_s23 = sphi %s2288_s23, %s3055_s23   ;;  %s2198_s22 = sphi %s2286_s22, %s3054_s22   ;;  %s2194_s21 = sphi %s2284_s21, %s3053_s21   ;;  %s2190_s20 = sphi %s2282_s20, %s3052_s20  }
  0x12   : > { %3022 = sst [smem:[#allocation19_spill]] %s2222_s27  ;;  %s1439_s6 = sadd.s32 4294967294, %s2230_s29  }
  0x13   : > { %p59_p0 = scmp.ne.s32.totalorder %s2206_s24, %s2202_s23  ;;  %p2338_p1 = scmp.eq.s32.totalorder %s1438_s30, 0 }
  0x14   : > { %p147_p2 = scmp.ne.s32.totalorder %s2198_s22, %s2194_s21  ;;  %p148_p4 = scmp.eq.s32.totalorder %s1438_s30, 3 }
  0x15   : > { %s3023_s7 = scalar_select %p2338_p1, 1, 0 }
  0x16   : > { %p2347_p3 = por %p2338_p1, %p59_p0  ;;  %p153_p5 = scmp.ne.s32.totalorder %s2194_s21, %s2190_s20 }
  0x17   : > { %p154_p6 = scmp.eq.s32.totalorder %s1439_s6, 3  ;;  %p2353_p7 = por %p148_p4, %p147_p2 }
  0x18   : > { %s3024_s9 = scalar_select %p2347_p3, 1, 0 }
  0x19   : > { %s3025_s10 = scalar_select %p2353_p7, 1, 0 }
  0x1a   : > { %p1440_p8 = scmp.ge.s32.totalorder %s2230_s29, 1  ;;  %p2358_p9 = por %p154_p6, %p153_p5 }
  0x1b   : > { %p189_p10 = scmp.lt.s32.totalorder %s2230_s29, 5  ;;  %s2232_s13 = smov [#allocation8]  }
  0x1c   : > { %s3026_s11 = scalar_select %p2358_p9, 1, 0 }
  0x1d   : > { %p2363_p11 = pnand %p1440_p8, %p189_p10  ;;  %s201_s14 = sshll.u32 %s2232_s13, 4  ;;  %s202_s14 = int_to_ptr.vmem [resolvable:$true] %s201_s14 }
  0x1e   : > { %3027 = sst [smem:[#allocation20_spill]] %s3026_s11  ;;  %s2233_s16 = smov [#allocation10]  }
  0x1f   : > { %s3028_s12 = scalar_select %p2363_p11, 1, 0 }
  0x20   : > { %p1786_p12 = pneg %p2363_p11  ;;  %s215_s17 = sshll.u32 %s2233_s16, 4  ;;  %s2375_s17 = int_to_ptr.vmem [resolvable:$true] %s215_s17 }
  0x21   : > { %s3030_s1 = sld [smem:[#allocation22_spill]] }
  0x22   : > { %p2371_p13 = pnand %p1786_p12, %p2338_p1 }
  0x24   : > { %p1988_p2 = pneg %p2371_p13 }
  0x27   : > { %s1986_s23 = scalar_lea.hbm %s3030_s1, 576 }
  0x28   : > { %p1987_p0 = scmp.ne.s32.totalorder %s3030_s1, %s1986_s23  ;;  %p1993_p6 = scmp.lt.u32.totalorder %s1986_s23, %s3030_s1 }
  0x2a   : > { %p1989_p4 = pnand %p1988_p2, %p1987_p0 }
  0x2c   : > { %p1990_p5 = pneg %p1989_p4 }
  0x2e   : > { %p1995_p8 = pnand %p1993_p6, %p1990_p5 }
  0x30   : > { %1998 = shalt.err (!%p1995_p8)
}
  0x31   : > { %s1999_s16 = scalar_lea.vmem %s202_s14, 576  ;;  %p2007_p7 = scmp.lt.s32.totalorder %s202_s14, %s202_s14 }
  0x32   : > { %p2000_p10 = scmp.ne.s32.totalorder %s202_s14, %s1999_s16  ;;  %p2008_p1 = scmp.lt.s32.totalorder %s1999_s16, %s1999_s16 }
  0x34   : > { %p2002_p12 = pnand %p2000_p10, %p1988_p2  ;;  %p2009_p3 = por %p2008_p1, %p2007_p7 }
  0x36   : > { %p2003_p9 = pneg %p2002_p12 }
  0x38   : > { %p2010_p11 = pnand %p2009_p3, %p2003_p9 }
  0x3a   : > { %2013 = shalt.err (!%p2010_p11)
}
  0x3b   : > { %s2234_s18 = smov 64   ;;  %s2235_s19 = smov 4  }
  0x3c   : > { %1789 = dma.hbm_to_vmem [thread:$0]  (!%p2371_p13), %s3030_s1, 576, %s202_s14, [#allocation9], %s2234_s18, %s2234_s18, %s2235_s19  }
  0x3d   : > { %s3031_s2 = sld [smem:[#allocation23_spill]] }
  0x43   : > { %s2014_s13 = scalar_lea.hbm %s3031_s2, 64 }
  0x44   : > { %p2015_p0 = scmp.ne.s32.totalorder %s3031_s2, %s2014_s13  ;;  %p2021_p7 = scmp.lt.u32.totalorder %s2014_s13, %s3031_s2 }
  0x46   : > { %p2017_p1 = pnand %p2015_p0, %p1988_p2 }
  0x48   : > { %p2018_p3 = pneg %p2017_p1 }
  0x4a   : > { %p2023_p9 = pnand %p2021_p7, %p2018_p3 }
  0x4c   : > { %2026 = shalt.err (!%p2023_p9)
}
  0x4d   : > { %s2027_s14 = scalar_lea.vmem %s2375_s17, 64  ;;  %p2035_p6 = scmp.lt.s32.totalorder %s2375_s17, %s2375_s17 }
  0x4e   : > { %p2028_p11 = scmp.ne.s32.totalorder %s2375_s17, %s2027_s14  ;;  %p2036_p8 = scmp.lt.s32.totalorder %s2027_s14, %s2027_s14 }
  0x50   : > { %p2030_p4 = pnand %p2028_p11, %p1988_p2  ;;  %p2037_p10 = por %p2036_p8, %p2035_p6 }
  0x52   : > { %p2031_p5 = pneg %p2030_p4 }
  0x54   : > { %p2038_p12 = pnand %p2037_p10, %p2031_p5 }
  0x56   : > { %2041 = shalt.err (!%p2038_p12)
}
  0x57   : > { %1792 = dma.hbm_to_vmem [thread:$0]  (!%p2371_p13), %s3031_s2, 64, %s2375_s17, [#allocation9]  }
  0x58   : > { %s36_s11 = sadd.s32 1, %s2222_s27  ;;  %s39_s18 = sadd.s32 1, %s2226_s28 }
  0x59   : > { %p37_p2 = scmp.ge.s32.totalorder %s36_s11, 2  ;;  %s46_s15 = sadd.s32 1, %s2210_s25 }
  0x5a   : > { %p53_p0 = scmp.ne.s32.totalorder %s2210_s25, %s2206_s24  ;;  %p54_p1 = scmp.eq.s32.totalorder %s2230_s29, 0 }
  0x5b   : > { %s3061_s11 = smov (%p37_p2, %s36_s11), 0  ;;  %s3063_s18 = smov (!%p37_p2, %s39_s18), %s2226_s28 }
  0x5c   : > { %3032 = sst [smem:[#allocation21_spill]] %s3061_s11  ;;  %p2433_p3 = por %p54_p1, %p53_p0 }
  0x5d   : > { %s133_s8 = ssub.s32 %s2222_s27, %s3061_s11  ;;  %p41_p13 = scmp.ge.s32.totalorder %s3063_s18, 2 }
  0x5e   : > { %p1806_p7 = scmp.lt.s32.totalorder %s2230_s29, 4  ;;  %s229_s17 = sand.u32 1, %s2210_s25  }
  0x5f   : > { %s1526_s23 = sshll.u32 %s2226_s28, 11  ;;  %s3065_s18 = smov (%p41_p13, %s3063_s18), 0 }
  0x60   : > { %s1444_s30 = sshll.u32 %s229_s17, 7  ;;  %s43_s6 = ssub.s32 %s2226_s28, %s3065_s18 }
  0x61   : > { %p44_p9 = scmp.eq.s32.totalorder %s43_s6, 0  ;;  %s134_s13 = sor.u32 %s133_s8, %s43_s6 }
  0x62   : > { %p135_p11 = scmp.eq.s32.totalorder %s134_s13, 0  ;;  %s2449_s4 = scalar_lea.hbm %s3002_s0, %s1526_s23 }
  0x63   : > { %s2452_s20 = scalar_select %p44_p9, %s2210_s25, %s46_s15  }
  0x64   : > { %s3034_s1 = sadd.s32 1, %s2198_s22  ;;  %s233_s11 = scalar_lea.vmem [#allocation5], %s1444_s30 }
  0x65   : > { %s2457_s2 = scalar_select %p135_p11, %s2198_s22, %s3034_s1  }
  0x66   : > { %s240_s27 = sshll.u32 %s233_s11, 4  ;;  %p2463_p4 = pnand %p1806_p7, %p2433_p3  ;;  %s2467_s27 = int_to_ptr.vmem [resolvable:$true] %s240_s27 }
  0x67   : > { %s2469_s23 = scalar_lea.sflag [#allocation6], %s229_s17  ;;  %s2042_s15 = scalar_lea.hbm %s2449_s4, 2048 }
  0x68   : > { %p2043_p5 = scmp.ne.s32.totalorder %s2449_s4, %s2042_s15  ;;  %p2044_p6 = pneg %p2463_p4 }
  0x69   : > { %s2047_s19 = scalar_lea.hbm %s3002_s0, 4096  ;;  %p2048_p12 = scmp.lt.u32.totalorder %s2449_s4, %s3002_s0 }
  0x6a   : > { %p2045_p8 = pnand %p2044_p6, %p2043_p5  ;;  %p2049_p2 = scmp.lt.u32.totalorder %s2047_s19, %s2042_s15 }
  0x6b   : > { %p2051_p1 = scmp.lt.u32.totalorder %s2042_s15, %s2449_s4 }
  0x6c   : > { %p2046_p10 = pneg %p2045_p8  ;;  %p2050_p0 = por %p2049_p2, %p2048_p12 }
  0x6e   : > { %p2052_p3 = por %p2051_p1, %p2050_p0 }
  0x70   : > { %p2053_p13 = pnand %p2052_p3, %p2046_p10 }
  0x72   : > { %2056 = shalt.err (!%p2053_p13)
}
  0x73   : > { %s2057_s17 = scalar_lea.vmem %s2467_s27, 2048  ;;  %s2236_s13 = smov [#allocation5]  }
  0x74   : > { %p2058_p7 = scmp.ne.s32.totalorder %s2467_s27, %s2057_s17  ;;  %s2062_s16 = sshll.u32 %s2236_s13, 4  ;;  %s2063_s16 = int_to_ptr.vmem [resolvable:$false] %s2062_s16 }
  0x75   : > { %s2064_s14 = scalar_lea.vmem %s2063_s16, 4096  ;;  %p2065_p5 = scmp.lt.s32.totalorder %s2467_s27, %s2063_s16 }
  0x76   : > { %p2060_p9 = pnand %p2058_p7, %p2044_p6  ;;  %p2066_p8 = scmp.lt.s32.totalorder %s2064_s14, %s2057_s17 }
  0x78   : > { %p2061_p11 = pneg %p2060_p9  ;;  %p2067_p12 = por %p2066_p8, %p2065_p5 }
  0x7a   : > { %p2068_p2 = pnand %p2067_p12, %p2061_p11 }
  0x7c   : > { %2071 = shalt.err (!%p2068_p2)
}
  0x7d   : > { %s2237_s15 = smov 256   ;;  %s2238_s1 = smov 16  }
  0x7e   : > { %1796 = dma.hbm_to_vmem [thread:$0]  (!%p2463_p4), %s2449_s4, 2048, %s2467_s27, %s2469_s23, %s2237_s15, %s2237_s15, %s2238_s1  }
  0x7f   : > { %p3036_p6 = scmp.ne.s32.totalorder %s3028_s12, 0 }
  0x80   : > { %s254_s11 = sand.u32 (!%p3036_p6), 1, %s2206_s24   ;;  %p3037_p10 = scmp.ne.s32.totalorder (!%p3036_p6), %s3024_s9, 0 }
  0x81   : > { %252 = sbr.rel (%p3036_p6) target bundleno = 1324 (0x52c), region = 36  ;;  %s1448_s19 = sshll.u32 (!%p3036_p6), %s254_s11, 7 }
  0x82   : > { %s255_s30 = scalar_lea.sflag (!%p3036_p6), [#allocation6], %s254_s11  ;;  %s2500_s6 = scalar_lea.vmem (!%p3036_p6), [#allocation5], %s1448_s19 }
  0x88   : > { %2173 = dma.done.wait (%p3037_p10), %s255_s30, 2048  }
  0x89   : > { %2175 = vsyncadd (%p3037_p10), %s255_s30, 4294965248  ;;  %p3038_p0 = scmp.ne.s32.totalorder %s3023_s7, 0 }
  0x8b   : > { %2177 = dma.done.wait (%p3038_p0), [#allocation9], 640  }
  0x8c   : > { %2179 = vsyncadd (%p3038_p0), [#allocation9], 4294966656  ;;  %s2511_s27 = sand.u32 1, %s2194_s21   ;;  %p1453_p4 = scmp.ne.s32.totalorder %s2214_s3, 0 }
  0x8d   : > { %s1451_s12 = sshll.u32 %s2511_s27, 6  ;;  %s1452_s4 = sshll.u32 %s2511_s27, 7  ;;  %v304_v0 = vld [vmem:[%s2500_s6 + $0x8] sm:$0xff] (!%p1453_p4)  ;;  %v306_v1 = vld [vmem:[%s2500_s6 + $0x18] sm:$0xff] (!%p1453_p4)  ;;  %v303_v2 = vld [vmem:[%s2500_s6] sm:$0xff] (!%p1453_p4)  ;;  %v2239_v7 = vmov (!%p1453_p4), 0  }
  0x8e   : > { %s2515_s8 = scalar_lea.vmem [#allocation11], %s1451_s12  ;;  %s2517_s23 = scalar_lea.vmem [#allocation12], %s1452_s4  ;;  %v320_v3 = vpack.c.bf16 (!%p1453_p4), %v306_v1, %v304_v0  ;;  %v305_v4 = vld [vmem:[%s2500_s6 + $0x10] sm:$0xff] (!%p1453_p4)  ;;  %v308_v5 = vld [vmem:[%s2500_s6 + $0x28] sm:$0xff] (!%p1453_p4)  ;;  %v310_v6 = vld [vmem:[%s2500_s6 + $0x38] sm:$0xff] (!%p1453_p4)  ;;  %407 = vmatprep.mubr.bf16.mxu0 (!%p1453_p4), %v2239_v7  ;;  %437 = vmatprep.mubr.bf16.mxu1 (!%p1453_p4), %v2239_v7  ;;  %vm359_vm0 = vcmask (!%p1453_p4), 523264  }
  0x8f   : > { %302 = sbr.rel (%p1453_p4) target bundleno = 394 (0x18a), region = 52  ;;  %v319_v8 = vpack.c.bf16 (!%p1453_p4), %v305_v4, %v303_v2  ;;  %v322_v9 = vpack.c.bf16 (!%p1453_p4), %v310_v6, %v308_v5  ;;  %v307_v10 = vld [vmem:[%s2500_s6 + $0x20] sm:$0xff] (!%p1453_p4)  ;;  %v309_v11 = vld [vmem:[%s2500_s6 + $0x30] sm:$0xff] (!%p1453_p4)  ;;  %v312_v12 = vld [vmem:[%s2500_s6 + $0x48] sm:$0xff] (!%p1453_p4) }
  0x90   : > { %375 = vmatprep.subr.bf16.mxu0 (!%p1453_p4), %v320_v3  ;;  %1763 = vmatprep.subr.bf16.mxu1 (!%p1453_p4), %v320_v3  ;;  %v314_v13 = vld [vmem:[%s2500_s6 + $0x58] sm:$0xff] (!%p1453_p4)  ;;  %v321_v14 = vpack.c.bf16 (!%p1453_p4), %v309_v11, %v307_v10  ;;  %v311_v15 = vld [vmem:[%s2500_s6 + $0x40] sm:$0xff] (!%p1453_p4)  ;;  %v313_v16 = vld [vmem:[%s2500_s6 + $0x50] sm:$0xff] (!%p1453_p4) }
  0x91   : > { %376 = vmatpush1.bf16.msra.mxu0 (!%p1453_p4), %v319_v8  ;;  %1767 = vmatpush1.bf16.msra.mxu1 (!%p1453_p4), %v319_v8  ;;  %v324_v17 = vpack.c.bf16 (!%p1453_p4), %v314_v13, %v312_v12  ;;  %v316_v18 = vld [vmem:[%s2500_s6 + $0x68] sm:$0xff] (!%p1453_p4)  ;;  %v318_v19 = vld [vmem:[%s2500_s6 + $0x78] sm:$0xff] (!%p1453_p4)  ;;  %v323_v20 = vpack.c.bf16 (!%p1453_p4), %v313_v16, %v311_v15  ;;  %v315_v21 = vld [vmem:[%s2500_s6 + $0x60] sm:$0xff] (!%p1453_p4) }
  0x92   : > { %377 = vmatprep.subr.bf16.mxu0 (!%p1453_p4), %v322_v9  ;;  %1764 = vmatprep.subr.bf16.mxu1 (!%p1453_p4), %v322_v9  ;;  %v326_v22 = vpack.c.bf16 (!%p1453_p4), %v318_v19, %v316_v18  ;;  %v317_v23 = vld [vmem:[%s2500_s6 + $0x70] sm:$0xff] (!%p1453_p4)  ;;  %v1913_v25 = vld [vmem:[#allocation8] sm:$0xff] (!%p1453_p4)   ;;  %v1914_v26 = vld [vmem:[#allocation8 + $0x18] sm:$0xff] (!%p1453_p4)  }
  0x93   : > { %v325_v24 = vpack.c.bf16 (!%p1453_p4), %v317_v23, %v315_v21  ;;  %v1915_v27 = vld [vmem:[#allocation8 + $0x8] sm:$0xff] (!%p1453_p4)   ;;  %v1916_v28 = vld [vmem:[#allocation8 + $0x20] ss:$0 sps:$4 sm:$0xff] (!%p1453_p4)   ;;  %v1917_v29 = vld [vmem:[#allocation8 + $0x10] sm:$0xff] (!%p1453_p4)  }
  0x95   : > { %378 = vmatpush1.bf16.msra.mxu0 (!%p1453_p4), %v321_v14  ;;  %1768 = vmatpush1.bf16.msra.mxu1 (!%p1453_p4), %v321_v14 }
  0x96   : > { %379 = vmatprep.subr.bf16.mxu0 %v324_v17  ;;  %1765 = vmatprep.subr.bf16.mxu1 %v324_v17 }
  0x99   : > { %380 = vmatpush1.bf16.msra.mxu0 %v323_v20  ;;  %1769 = vmatpush1.bf16.msra.mxu1 %v323_v20 }
  0x9a   : > { %381 = vmatprep.subr.bf16.mxu0 %v326_v22  ;;  %1766 = vmatprep.subr.bf16.mxu1 %v326_v22 }
  0x9d   : > { %382 = vmatpush1.bf16.msra.mxu0 %v325_v24  ;;  %1770 = vmatpush1.bf16.msra.mxu1 %v325_v24 }
  0xa0   : > { %1459 = vmatmul.mubr.msk.bf16.vlgmr.msra.gmra.mrb[0].mxu0 %vm359_vm0, %v1913_v25  ;;  %1462 = vmatmul.mubr.msk.bf16.vlgmr.msra.gmra.mrb[0].mxu1 %vm359_vm0, %v1914_v26 }
  0xa1   : > { %417 = vmatprep.mubr.bf16.mxu0 %v2239_v7  ;;  %447 = vmatprep.mubr.bf16.mxu1 %v2239_v7 }
  0xa8   : > { %1460 = vmatmul.mubr.msk.bf16.gmra.mrb[4].mxu0 %vm359_vm0, %v1915_v27  ;;  %1463 = vmatmul.mubr.msk.bf16.gmra.mrb[4].mxu1 %vm359_vm0, %v1916_v28 }
  0xa9   : > { %427 = vmatprep.mubr.bf16.mxu0 %v2239_v7 }
  0xb0   : > { %1461 = vmatmul.mubr.msk.bf16.gmra.mrb[8].mxu0 %vm359_vm0, %v1917_v29 }
 0x173   : > { %v409_v30 = vpop.f32.mrb[0].mxu0  ;;  %v439_v31 = vpop.f32.mrb[0].mxu1 }
 0x174   : > { %v411_v32 = vpop.f32.mrb[1].mxu0  ;;  %v441_v33 = vpop.f32.mrb[1].mxu1 }
 0x175   : > { %v1527_v34 = vpack.c.bf16 %v411_v32, %v409_v30  ;;  %v413_v35 = vpop.f32.mrb[2].mxu0  ;;  %v443_v36 = vpop.f32.mrb[2].mxu1 }
 0x176   : > { %v415_v37 = vpop.f32.mrb[3].mxu0  ;;  %v445_v38 = vpop.f32.mrb[3].mxu1 }
 0x177   : > { %464 = vst [vmem:[#allocation2] sm:$0xff] %v1527_v34 }
 0x17b   : > { %v419_v39 = vpop.f32.mrb[4].mxu0  ;;  %v449_v40 = vpop.f32.mrb[4].mxu1 }
 0x17c   : > { %v465_v41 = vpack.c.bf16 %v419_v39, %v413_v35  ;;  %v421_v42 = vpop.f32.mrb[5].mxu0  ;;  %v471_v43 = vpack.c.bf16 %v449_v40, %v443_v36  ;;  %v451_v44 = vpop.f32.mrb[5].mxu1 }
 0x17d   : > { %v466_v45 = vpack.c.bf16 %v421_v42, %v415_v37  ;;  %v423_v46 = vpop.f32.mrb[6].mxu0  ;;  %v472_v47 = vpack.c.bf16 %v451_v44, %v445_v38  ;;  %v453_v48 = vpop.f32.mrb[6].mxu1 }
 0x17e   : > { %473 = vst [vmem:[#allocation3] sm:$0xff] %v465_v41  ;;  %479 = vst [vmem:[#allocation3 + $0x30] sm:$0xff] %v471_v43  ;;  %v425_v49 = vpop.f32.mrb[7].mxu0  ;;  %v454_v50 = vpop.f32.mrb[7].mxu1 }
 0x17f   : > { %474 = vst [vmem:[#allocation3 + $0x8] sm:$0xff] %v466_v45  ;;  %480 = vst [vmem:[#allocation3 + $0x38] sm:$0xff] %v472_v47 }
 0x183   : > { %v429_v51 = vpop.f32.mrb[8].mxu0 }
 0x184   : > { %v467_v52 = vpack.c.bf16 %v429_v51, %v423_v46  ;;  %v431_v53 = vpop.f32.mrb[9].mxu0 }
 0x185   : > { %v468_v54 = vpack.c.bf16 %v431_v53, %v425_v49  ;;  %v433_v55 = vpop.f32.mrb[10].mxu0 }
 0x186   : > { %475 = vst [vmem:[#allocation3 + $0x10] sm:$0xff] %v467_v52  ;;  %v469_v56 = vpack.c.bf16 %v439_v31, %v433_v55  ;;  %v435_v57 = vpop.f32.mrb[11].mxu0 }
 0x187   : > { %476 = vst [vmem:[#allocation3 + $0x18] sm:$0xff] %v468_v54  ;;  %v470_v58 = vpack.c.bf16 %v441_v33, %v435_v57 }
 0x188   : > { %477 = vst [vmem:[#allocation3 + $0x20] sm:$0xff] %v469_v56 }
 0x189   : > { %478 = vst [vmem:[#allocation3 + $0x28] sm:$0xff] %v470_v58 }
 0x18a PF: > { %s1465_s7 = sshll.u32 %s2214_s3, 7  ;;  %v2240_v59 = vmov 0.0   ;;  %vm2241_vm1 = vmmov 0   ;;  %v544_v60 = vld [vmem:[#allocation2] sm:$0xff]  ;;  %v494_v10 = vld [vmem:[#allocation10] sm:$0xf] }
 0x18b   : > { %1717 = vmatprep.subr.bf16.mxu0 %v2240_v59  ;;  %s482_s9 = sshra.s32 %s1465_s7, 7  ;;  %1725 = vmatprep.mubr.msk.bf16.mxu0 %vm2241_vm1, %v2240_v59  ;;  %v1468_v61 = vcombine.low %v544_v60, %v544_v60  ;;  %vm499_vm2 = vcmask 523264   ;;  %v1469_v11 = vcombine.high %v544_v60, %v544_v60  ;;  %vm584_vm3 = vcmask 64512   ;;  %s1522_s16 = sshll.u32 %s2218_s26, 6 }
 0x18c   : > { %s1466_s17 = sshll.u32 %s482_s9, 3  ;;  %vm633_vm4 = vcmask 1043456   ;;  %s1294_s14 = sadd.s32 %s2214_s3, %s1522_s16 }
 0x18d   : > { %s485_s13 = scalar_lea.vmem %s2500_s6, %s1466_s17 [#allocation5]  ;;  %552 = vxpose.xlu0.c.b16.start.end [1/1] (short) %v1468_v61, 128  ;;  %s1297_s15 = sshll.u32 %s2517_s23, 4  ;;  %s2882_s15 = int_to_ptr.vmem [resolvable:$true] %s1297_s15 }
 0x18e   : > { %v2538_v62 = vld [vmem:[%s485_s13] sm:$0xff]  ;;  %v2540_v63 = vld [vmem:[%s485_s13 + $0x10] sm:$0xff]  ;;  %s1523_s1 = sshll.u32 %s1294_s14, 6  ;;  %s1266_s6 = scalar_lea.sflag [#allocation13], %s2511_s27 }
 0x18f   : > { %v2542_v0 = vld [vmem:[%s485_s13 + $0x20] sm:$0xff]  ;;  %v495_v1 = vpack.c.bf16 %v2540_v63, %v2538_v62  ;;  %v2546_v2 = vld [vmem:[%s485_s13 + $0x30] sm:$0xff]  ;;  %s2887_s30 = scalar_lea.hbm %s3007_s5, %s1523_s1  ;;  %s2072_s12 = scalar_lea.vmem %s2882_s15, 2048 }
 0x190   : > { %v496_v3 = vpack.c.bf16 %v2546_v2, %v2542_v0  ;;  %v2550_v4 = vld [vmem:[%s485_s13 + $0x40] sm:$0xff]  ;;  %v2552_v5 = vld [vmem:[%s485_s13 + $0x50] sm:$0xff]  ;;  %p2073_p1 = scmp.ne.s32.totalorder %s2882_s15, %s2072_s12  ;;  %p3044_p3 = scmp.ne.s32.totalorder %s3025_s10, 0 }
 0x191   : > { %1718 = vmatpush3.bf16.msra.mxu0 %v495_v1  ;;  %v497_v6 = vpack.c.bf16 %v2552_v5, %v2550_v4  ;;  %v2556_v7 = vld [vmem:[%s485_s13 + $0x60] sm:$0xff]  ;;  %v2558_v8 = vld [vmem:[%s485_s13 + $0x70] sm:$0xff]  ;;  %s2242_s4 = smov [#allocation12]  }
 0x192   : > { %1719 = vmatprep.subr.bf16.mxu0 %v2240_v59  ;;  %v498_v9 = vpack.c.bf16 %v2558_v8, %v2556_v7  ;;  %p2074_p13 = pnand %p2073_p1, %p3044_p3  ;;  %s2076_s7 = sshll.u32 %s2242_s4, 4  ;;  %s2077_s7 = int_to_ptr.vmem [resolvable:$false] %s2076_s7 }
 0x193   : > { %p2079_p9 = scmp.lt.s32.totalorder %s2882_s15, %s2077_s7 }
 0x194   : > { %p2075_p7 = pneg %p2074_p13 }
 0x195   : > { %1720 = vmatpush3.bf16.msra.mxu0 %v496_v3 }
 0x196   : > { %1721 = vmatprep.subr.bf16.mxu0 %v2240_v59 }
 0x199   : > { %1722 = vmatpush3.bf16.msra.mxu0 %v497_v6 }
 0x19a   : > { %1723 = vmatprep.subr.bf16.mxu0 %v2240_v59 }
 0x19d   : > { %1724 = vmatpush3.bf16.msra.mxu0 %v498_v9 }
 0x1a0   : > { %1726 = vmatmul.mubr.msk.bf16.vlgmr.msra.gmra.mrb[0].mxu0 %vm499_vm2, %v494_v10 }
 0x1aa   : > { %568 = vxpose.xlu0.c.b16.start.end [1/1] (short) %v1469_v11, 128 }
 0x1f3   : > { %v560_v12 = vpop.trf.xlu0 }
 0x1f4   : > { %1731 = vmatprep.mubr.msk.bf16.mxu1 %vm584_vm3, %v560_v12 }
 0x1f7   : > { %v561_v13 = vpop.trf.xlu0 }
 0x1fb   : > { %v562_v14 = vpop.trf.xlu0 }
 0x1ff   : > { %v563_v15 = vpop.trf.xlu0 }
 0x203   : > { %v564_v16 = vpop.trf.xlu0 }
 0x207   : > { %v565_v17 = vpop.trf.xlu0 }
 0x20b   : > { %v566_v24 = vpop.trf.xlu0 }
 0x20f   : > { %v567_v25 = vpop.trf.xlu0 }
 0x213   : > { %v576_v26 = vpop.trf.xlu0 }
 0x217   : > { %v577_v27 = vpop.trf.xlu0 }
 0x21b   : > { %v578_v28 = vpop.trf.xlu0 }
 0x21f   : > { %v579_v29 = vpop.trf.xlu0 }
 0x223   : > { %v580_v30 = vpop.trf.xlu0 }
 0x227   : > { %v581_v31 = vpop.trf.xlu0 }
 0x22b   : > { %v582_v32 = vpop.trf.xlu0 }
 0x22f   : > { %v583_v33 = vpop.trf.xlu0 }
 0x273   : > { %v537_v18 = vpop.f32.mrb[0].mxu0 }
 0x274   : > { %v543_v19 = vpack.c.bf16 %v537_v18, %v537_v18  ;;  %v1727_v20 = vpop.f32.mrb[1].mxu0 }
 0x275   : > { %v540_v21 = vpop.f32.mrb[2].mxu0 }
 0x276   : > { %v1728_v22 = vpop.f32.mrb[3].mxu0  ;;  %1771 = vmatprep.subr.msk.bf16.mxu1 %vm633_vm4, %v543_v19  ;;  %v635_v23 = vsel %vm633_vm4, %v543_v19, 0 }
 0x277   : > { %1730 = vmatpush3.bf16.msra.mxu1 %v635_v23 }
 0x27a   : > { %1732 = vmatmul.mubr.msk.bf16.vlgmr.msra.gmra.mrb[0].mxu1 %vm584_vm3, %v561_v13 }
 0x27b   : > { %1735 = vmatprep.mubr.msk.bf16.mxu1 %vm584_vm3, %v562_v14 }
 0x282   : > { %1736 = vmatmul.mubr.msk.bf16.gmra.mrb[4].mxu1 %vm584_vm3, %v563_v15 }
 0x283   : > { %1739 = vmatprep.mubr.msk.bf16.mxu1 %vm584_vm3, %v564_v16 }
 0x28a   : > { %1740 = vmatmul.mubr.msk.bf16.gmra.mrb[8].mxu1 %vm584_vm3, %v565_v17 }
 0x28b   : > { %1743 = vmatprep.mubr.msk.bf16.mxu1 %vm584_vm3, %v566_v24 }
 0x292   : > { %1744 = vmatmul.mubr.msk.bf16.gmra.mrb[12].mxu1 %vm584_vm3, %v567_v25 }
 0x293   : > { %1747 = vmatprep.mubr.msk.bf16.mxu1 %vm584_vm3, %v576_v26 }
 0x29a   : > { %1748 = vmatmul.mubr.msk.bf16.gmra.mrb[16].mxu1 %vm584_vm3, %v577_v27 }
 0x29b   : > { %1751 = vmatprep.mubr.msk.bf16.mxu1 %vm584_vm3, %v578_v28 }
 0x2a2   : > { %1752 = vmatmul.mubr.msk.bf16.gmra.mrb[20].mxu1 %vm584_vm3, %v579_v29 }
 0x2a3   : > { %1755 = vmatprep.mubr.msk.bf16.mxu1 %vm584_vm3, %v580_v30 }
 0x2aa   : > { %1756 = vmatmul.mubr.msk.bf16.gmra.mrb[24].mxu1 %vm584_vm3, %v581_v31 }
 0x2ab   : > { %1759 = vmatprep.mubr.msk.bf16.mxu1 %vm584_vm3, %v582_v32 }
 0x2b2   : > { %1760 = vmatmul.mubr.msk.bf16.gmra.mrb[28].mxu1 %vm584_vm3, %v583_v33 }
 0x34d   : > { %v2578_v34 = vpop.f32.mrb[0].mxu1 }
 0x34e   : > { %v2580_v35 = vpop.f32.mrb[1].mxu1 }
 0x34f   : > { %v2582_v36 = vpop.f32.mrb[2].mxu1 }
 0x350   : > { %v2584_v37 = vpop.f32.mrb[3].mxu1 }
 0x355   : > { %v2586_v38 = vpop.f32.mrb[4].mxu1 }
 0x356   : > { %v800_v39 = vmax.f32 %v2578_v34, %v2586_v38  ;;  %v2590_v40 = vpop.f32.mrb[5].mxu1 }
 0x357   : > { %v798_v41 = vmax.f32 %v2580_v35, %v2590_v40  ;;  %v2594_v42 = vpop.f32.mrb[6].mxu1 }
 0x358   : > { %v801_v43 = vmax.f32 %v2582_v36, %v2594_v42  ;;  %v2598_v44 = vpop.f32.mrb[7].mxu1 }
 0x359   : > { %v799_v45 = vmax.f32 %v2584_v37, %v2598_v44 }
 0x35d   : > { %v2602_v46 = vpop.f32.mrb[8].mxu1 }
 0x35e   : > { %v804_v47 = vmax.f32 %v800_v39, %v2602_v46  ;;  %v2605_v48 = vpop.f32.mrb[9].mxu1 }
 0x35f   : > { %v802_v49 = vmax.f32 %v798_v41, %v2605_v48  ;;  %v2608_v50 = vpop.f32.mrb[10].mxu1 }
 0x360   : > { %v805_v51 = vmax.f32 %v801_v43, %v2608_v50  ;;  %v2611_v52 = vpop.f32.mrb[11].mxu1 }
 0x361   : > { %v803_v53 = vmax.f32 %v799_v45, %v2611_v52 }
 0x365   : > { %v2614_v54 = vpop.f32.mrb[12].mxu1 }
 0x366   : > { %v808_v55 = vmax.f32 %v804_v47, %v2614_v54  ;;  %v2617_v56 = vpop.f32.mrb[13].mxu1 }
 0x367   : > { %v806_v57 = vmax.f32 %v802_v49, %v2617_v56  ;;  %v2620_v58 = vpop.f32.mrb[14].mxu1 }
 0x368   : > { %v809_v59 = vmax.f32 %v805_v51, %v2620_v58  ;;  %v2623_v60 = vpop.f32.mrb[15].mxu1 }
 0x369   : > { %v807_v61 = vmax.f32 %v803_v53, %v2623_v60 }
 0x36d   : > { %v2626_v1 = vpop.f32.mrb[16].mxu1 }
 0x36e   : > { %v812_v3 = vmax.f32 %v808_v55, %v2626_v1  ;;  %v2629_v6 = vpop.f32.mrb[17].mxu1 }
 0x36f   : > { %v810_v9 = vmax.f32 %v806_v57, %v2629_v6  ;;  %v2632_v10 = vpop.f32.mrb[18].mxu1 }
 0x370   : > { %v813_v11 = vmax.f32 %v809_v59, %v2632_v10  ;;  %v2635_v12 = vpop.f32.mrb[19].mxu1 }
 0x371   : > { %v811_v13 = vmax.f32 %v807_v61, %v2635_v12 }
 0x375   : > { %v2638_v14 = vpop.f32.mrb[20].mxu1 }
 0x376   : > { %v816_v15 = vmax.f32 %v812_v3, %v2638_v14  ;;  %v2641_v16 = vpop.f32.mrb[21].mxu1 }
 0x377   : > { %v814_v17 = vmax.f32 %v810_v9, %v2641_v16  ;;  %v2644_v18 = vpop.f32.mrb[22].mxu1 }
 0x378   : > { %v817_v19 = vmax.f32 %v813_v11, %v2644_v18  ;;  %v2647_v20 = vpop.f32.mrb[23].mxu1 }
 0x379   : > { %v815_v21 = vmax.f32 %v811_v13, %v2647_v20 }
 0x37d   : > { %v2650_v22 = vpop.f32.mrb[24].mxu1 }
 0x37e   : > { %v820_v23 = vmax.f32 %v816_v15, %v2650_v22  ;;  %v2653_v24 = vpop.f32.mrb[25].mxu1 }
 0x37f   : > { %v818_v25 = vmax.f32 %v814_v17, %v2653_v24  ;;  %v2656_v26 = vpop.f32.mrb[26].mxu1 }
 0x380   : > { %v821_v27 = vmax.f32 %v817_v19, %v2656_v26  ;;  %v2659_v28 = vpop.f32.mrb[27].mxu1 }
 0x381   : > { %v819_v29 = vmax.f32 %v815_v21, %v2659_v28 }
 0x385   : > { %v2662_v30 = vpop.f32.mrb[28].mxu1 }
 0x386   : > { %v824_v31 = vmax.f32 %v820_v23, %v2662_v30  ;;  %v2665_v32 = vpop.f32.mrb[29].mxu1 }
 0x387   : > { %v822_v33 = vmax.f32 %v818_v25, %v2665_v32  ;;  %v2668_v39 = vpop.f32.mrb[30].mxu1 }
 0x388   : > { %v825_v41 = vmax.f32 %v821_v27, %v2668_v39  ;;  %v2671_v43 = vpop.f32.mrb[31].mxu1 }
 0x389   : > { %v823_v45 = vmax.f32 %v819_v29, %v2671_v43 }
 0x38a   : > { %v827_v47 = vmax.f32 %v824_v31, %v825_v41 }
 0x38b   : > { %v826_v49 = vmax.f32 %v822_v33, %v823_v45  ;;  %v1162_v33 = vld [vmem:[#allocation3 + $0x8] sm:$0xff] }
 0x38c   : > { %1201 = vmatprep.mubr.bf16.mxu0 %v1162_v33 }
 0x38d   : > { %v828_v51 = vmax.f32 %v826_v49, %v827_v47 }
 0x38f   : > { %v829_v53 = vrot.slane %v828_v51, 4 }
 0x391   : > { %v830_v55 = vmax.f32 %v828_v51, %v829_v53 }
 0x393   : > { %v831_v57 = vrot.slane %v830_v55, 2 }
 0x395   : > { %v832_v59 = vmax.f32 %v830_v55, %v831_v57 }
 0x397   : > { %v833_v61 = vrot.slane %v832_v59, 1 }
 0x399   : > { %v2674_v3 = vmax.f32 %v832_v59, %v833_v61 }
 0x39b   : > { %v835_v9 = vsub.f32 %v2580_v35, %v2674_v3  ;;  %v836_v11 = vsub.f32 %v2584_v37, %v2674_v3  ;;  %v837_v13 = vsub.f32 %v2578_v34, %v2674_v3  ;;  %v838_v15 = vsub.f32 %v2582_v36, %v2674_v3 }
 0x39c   : > { %v839_v17 = vsub.f32 %v2590_v40, %v2674_v3  ;;  %v840_v19 = vsub.f32 %v2598_v44, %v2674_v3  ;;  %v841_v21 = vsub.f32 %v2586_v38, %v2674_v3  ;;  %v842_v35 = vsub.f32 %v2594_v42, %v2674_v3 }
 0x39d   : > { %v843_v37 = vsub.f32 %v2605_v48, %v2674_v3  ;;  %v844_v34 = vsub.f32 %v2611_v52, %v2674_v3  ;;  %v845_v36 = vsub.f32 %v2602_v46, %v2674_v3  ;;  %v846_v40 = vsub.f32 %v2608_v50, %v2674_v3 }
 0x39e   : > { %v847_v44 = vsub.f32 %v2617_v56, %v2674_v3  ;;  %v848_v38 = vsub.f32 %v2623_v60, %v2674_v3  ;;  %v849_v42 = vsub.f32 %v2614_v54, %v2674_v3  ;;  %v850_v48 = vsub.f32 %v2620_v58, %v2674_v3 }
 0x39f   : > { %v851_v52 = vsub.f32 %v2629_v6, %v2674_v3  ;;  %v852_v46 = vsub.f32 %v2635_v12, %v2674_v3  ;;  %v853_v50 = vsub.f32 %v2626_v1, %v2674_v3  ;;  %v854_v56 = vsub.f32 %v2632_v10, %v2674_v3 }
 0x3a0   : > { %v855_v60 = vsub.f32 %v2641_v16, %v2674_v3  ;;  %v856_v54 = vsub.f32 %v2647_v20, %v2674_v3  ;;  %v857_v23 = vsub.f32 %v2638_v14, %v2674_v3  ;;  %v858_v25 = vsub.f32 %v2644_v18, %v2674_v3 }
 0x3a1   : > { %v859_v27 = vsub.f32 %v2653_v24, %v2674_v3  ;;  %v860_v29 = vsub.f32 %v2659_v28, %v2674_v3  ;;  %v866_v49 = vsub.f32 %v2668_v39, %v2674_v3  ;;  %v867_v51 = vmul.f32 1.442695, %v835_v9 }
 0x3a2   : > { %v869_v53 = vmul.f32 1.442695, %v836_v11  ;;  %v871_v55 = vmul.f32 1.442695, %v837_v13  ;;  %v873_v57 = vmul.f32 1.442695, %v838_v15  ;;  %v3039_v18 = vsub.f32 %v2650_v22, %v2674_v3 }
 0x3a3   : > { %1920 = vpow2.f32 %v867_v51  ;;  %v875_v59 = vmul.f32 1.442695, %v839_v17  ;;  %v877_v61 = vmul.f32 1.442695, %v840_v19  ;;  %v879_v41 = vmul.f32 1.442695, %v841_v21 }
 0x3a4   : > { %1922 = vpow2.f32 %v869_v53  ;;  %v881_v45 = vmul.f32 1.442695, %v842_v35  ;;  %v883_v9 = vmul.f32 1.442695, %v843_v37  ;;  %v885_v15 = vmul.f32 1.442695, %v844_v34 }
 0x3a5   : > { %1924 = vpow2.f32 %v871_v55  ;;  %v887_v21 = vmul.f32 1.442695, %v845_v36  ;;  %v891_v53 = vmul.f32 1.442695, %v847_v44  ;;  %v893_v55 = vmul.f32 1.442695, %v848_v38 }
 0x3a6   : > { %1926 = vpow2.f32 %v873_v57  ;;  %v897_v44 = vmul.f32 1.442695, %v850_v48  ;;  %v899_v38 = vmul.f32 1.442695, %v851_v52  ;;  %v917_v14 = vmul.f32 1.442695, %v860_v29 }
 0x3a7   : > { %1928 = vpow2.f32 %v875_v59  ;;  %v895_v59 = vmul.f32 1.442695, %v849_v42  ;;  %v3040_v24 = vsub.f32 %v2656_v26, %v2674_v3  ;;  %v3041_v28 = vsub.f32 %v2665_v32, %v2674_v3 }
 0x3a8   : > { %1930 = vpow2.f32 %v877_v61  ;;  %v3042_v22 = vsub.f32 %v2671_v43, %v2674_v3  ;;  %v3043_v26 = vsub.f32 %v2662_v30, %v2674_v3  ;;  %v929_v32 = vmul.f32 1.442695, %v866_v49 }
 0x3a9   : > { %1932 = vpow2.f32 %v879_v41  ;;  %v889_v41 = vmul.f32 1.442695, %v846_v40  ;;  %v923_v29 = vmul.f32 1.442695, %v3041_v28 }
 0x3aa   : > { %1934 = vpow2.f32 %v881_v45 }
 0x3ab   : > { %1936 = vpow2.f32 %v883_v9 }
 0x3ac   : > { %1938 = vpow2.f32 %v885_v15 }
 0x3ad   : > { %v2740_v47 = vpop.eup %1920  ;;  %1940 = vpow2.f32 %v887_v21  ;;  %v903_v21 = vmul.f32 1.442695, %v853_v50 }
 0x3ae   : > { %v2742_v31 = vpop.eup %1922  ;;  %1942 = vpow2.f32 %v889_v41  ;;  %v907_v41 = vmul.f32 1.442695, %v855_v60 }
 0x3af   : > { %v931_v11 = vadd.f32 %v2742_v31, %v2740_v47  ;;  %v2746_v13 = vpop.eup %1924  ;;  %1944 = vpow2.f32 %v891_v53  ;;  %v911_v53 = vmul.f32 1.442695, %v857_v23 }
 0x3b0   : > { %v2749_v19 = vpop.eup %1926  ;;  %1946 = vpow2.f32 %v893_v55 }
 0x3b1   : > { %v932_v17 = vadd.f32 %v2746_v13, %v931_v11  ;;  %v2752_v33 = vpop.eup %1928  ;;  %1948 = vpow2.f32 %v895_v59 }
 0x3b2   : > { %v2755_v51 = vpop.eup %1930  ;;  %1950 = vpow2.f32 %v897_v44 }
 0x3b3   : > { %v933_v35 = vadd.f32 %v2749_v19, %v932_v17  ;;  %v2758_v45 = vpop.eup %1932  ;;  %v901_v17 = vmul.f32 1.442695, %v852_v46  ;;  %1952 = vpow2.f32 %v899_v38 }
 0x3b4   : > { %v2761_v57 = vpop.eup %1934 }
 0x3b5   : > { %v934_v37 = vadd.f32 %v2752_v33, %v933_v35  ;;  %v2764_v61 = vpop.eup %1936  ;;  %1954 = vpow2.f32 %v901_v17  ;;  %v905_v35 = vmul.f32 1.442695, %v854_v56 }
 0x3b6   : > { %v2770_v11 = vpop.eup %1938  ;;  %1956 = vpow2.f32 %v903_v21  ;;  %v925_v21 = vmul.f32 1.442695, %v3042_v22 }
 0x3b7   : > { %v935_v34 = vadd.f32 %v2755_v51, %v934_v37  ;;  %v2776_v15 = vpop.eup %1940  ;;  %1958 = vpow2.f32 %v905_v35  ;;  %v909_v37 = vmul.f32 1.442695, %v856_v54  ;;  %v915_v54 = vmul.f32 1.442695, %v859_v27 }
 0x3b8   : > { %v2782_v48 = vpop.eup %1942  ;;  %1960 = vpow2.f32 %v907_v41  ;;  %v921_v27 = vmul.f32 1.442695, %v3040_v24 }
 0x3b9   : > { %v936_v36 = vadd.f32 %v2758_v45, %v935_v34  ;;  %v2788_v52 = vpop.eup %1944  ;;  %1962 = vpow2.f32 %v909_v37  ;;  %v913_v34 = vmul.f32 1.442695, %v858_v25  ;;  %v919_v25 = vmul.f32 1.442695, %v3039_v18 }
 0x3ba   : > { %v2794_v46 = vpop.eup %1946  ;;  %1964 = vpow2.f32 %v911_v53 }
 0x3bb   : > { %v937_v40 = vadd.f32 %v2761_v57, %v936_v36  ;;  %v2800_v50 = vpop.eup %1948  ;;  %1966 = vpow2.f32 %v913_v34 }
 0x3bc   : > { %v2806_v56 = vpop.eup %1950  ;;  %1968 = vpow2.f32 %v915_v54 }
 0x3bd   : > { %v938_v9 = vadd.f32 %v2764_v61, %v937_v40  ;;  %v1953_v60 = vpop.eup %1952  ;;  %1970 = vpow2.f32 %v917_v14 }
 0x3be   : > { %1972 = vpow2.f32 %v919_v25 }
 0x3bf   : > { %v939_v42 = vadd.f32 %v2770_v11, %v938_v9  ;;  %v1955_v20 = vpop.eup %1954  ;;  %1974 = vpow2.f32 %v921_v27 }
 0x3c0   : > { %v1957_v59 = vpop.eup %1956  ;;  %1976 = vpow2.f32 %v923_v29 }
 0x3c1   : > { %v940_v58 = vadd.f32 %v2776_v15, %v939_v42  ;;  %v1959_v40 = vpop.eup %1958  ;;  %1978 = vpow2.f32 %v925_v21 }
 0x3c2   : > { %v1961_v9 = vpop.eup %1960 }
 0x3c3   : > { %v941_v6 = vadd.f32 %v2782_v48, %v940_v58  ;;  %v1963_v42 = vpop.eup %1962 }
 0x3c4   : > { %v1965_v58 = vpop.eup %1964 }
 0x3c5   : > { %v942_v12 = vadd.f32 %v2788_v52, %v941_v6  ;;  %v1967_v35 = vpop.eup %1966 }
 0x3c7   : > { %v943_v1 = vadd.f32 %v2794_v46, %v942_v12  ;;  %v927_v12 = vmul.f32 1.442695, %v3043_v26 }
 0x3c9   : > { %v944_v10 = vadd.f32 %v2800_v50, %v943_v1  ;;  %v1969_v1 = vpop.eup %1968  ;;  %1980 = vpow2.f32 %v927_v12 }
 0x3ca   : > { %1982 = vpow2.f32 %v929_v32 }
 0x3cb   : > { %v945_v16 = vadd.f32 %v2806_v56, %v944_v10  ;;  %v1971_v10 = vpop.eup %1970 }
 0x3cc   : > { %v1973_v43 = vpop.eup %1972 }
 0x3cd   : > { %v946_v55 = vadd.f32 %v1953_v60, %v945_v16  ;;  %v1975_v34 = vpop.eup %1974 }
 0x3ce   : > { %v1977_v54 = vpop.eup %1976 }
 0x3cf   : > { %v947_v36 = vadd.f32 %v1955_v20, %v946_v55  ;;  %v1979_v30 = vpop.eup %1978 }
 0x3d1   : > { %v948_v23 = vadd.f32 %v1957_v59, %v947_v36 }
 0x3d3   : > { %v949_v44 = vadd.f32 %v1959_v40, %v948_v23  ;;  %v2839_v23 = vpop.eup %1980 }
 0x3d4   : > { %v2842_v25 = vpop.eup %1982 }
 0x3d5   : > { %v950_v38 = vadd.f32 %v1961_v9, %v949_v44 }
 0x3d7   : > { %v951_v17 = vadd.f32 %v1963_v42, %v950_v38 }
 0x3d9   : > { %v952_v6 = vadd.f32 %v1965_v58, %v951_v17 }
 0x3db   : > { %v953_v41 = vadd.f32 %v1967_v35, %v952_v6 }
 0x3dd   : > { %v954_v37 = vadd.f32 %v1969_v1, %v953_v41 }
 0x3df   : > { %v955_v53 = vadd.f32 %v1971_v10, %v954_v37 }
 0x3e1   : > { %v956_v16 = vadd.f32 %v1973_v43, %v955_v53 }
 0x3e3   : > { %v957_v55 = vadd.f32 %v1975_v34, %v956_v16 }
 0x3e5   : > { %v958_v36 = vadd.f32 %v1977_v54, %v957_v55 }
 0x3e7   : > { %v959_v14 = vadd.f32 %v1979_v30, %v958_v36 }
 0x3e9   : > { %v960_v18 = vadd.f32 %v2839_v23, %v959_v14 }
 0x3eb   : > { %v961_v39 = vadd.f32 %v2842_v25, %v960_v18 }
 0x3ed   : > { %v962_v3 = vrot.slane %v961_v39, 4 }
 0x3ef   : > { %v963_v49 = vadd.f32 %v962_v3, %v961_v39 }
 0x3f1   : > { %v964_v44 = vrot.slane %v963_v49, 2 }
 0x3f3   : > { %v965_v24 = vadd.f32 %v964_v44, %v963_v49 }
 0x3f5   : > { %v966_v27 = vrot.slane %v965_v24, 1 }
 0x3f7   : > { %v967_v38 = vadd.f32 %v966_v27, %v965_v24  ;;  %v1165_v24 = vld [vmem:[#allocation3 + $0x20] sm:$0xff]  ;;  %v1168_v27 = vld [vmem:[#allocation3 + $0x38] sm:$0xff] }
 0x3f9   : > { %1984 = vrcp.f32 %v967_v38  ;;  %v1167_v38 = vld [vmem:[#allocation3 + $0x30] sm:$0xff] }
 0x403   : > { %v1985_v28 = vpop.eup %1984 }
 0x404   : > { %v985_v29 = vmul.f32 %v1985_v28, %v1953_v60  ;;  %v986_v17 = vmul.f32 %v1985_v28, %v1955_v20  ;;  %v969_v22 = vmul.f32 %v1985_v28, %v2740_v47  ;;  %v970_v21 = vmul.f32 %v1985_v28, %v2742_v31 }
 0x405   : > { %v987_v6 = vmul.f32 %v1985_v28, %v1957_v59  ;;  %v988_v26 = vmul.f32 %v1985_v28, %v1959_v40  ;;  %v971_v12 = vmul.f32 %v1985_v28, %v2746_v13  ;;  %v972_v41 = vmul.f32 %v1985_v28, %v2749_v19 }
 0x406   : > { %v1009_v32 = vpack.c.bf16 %v986_v17, %v985_v29  ;;  %v1001_v37 = vpack.c.bf16 %v970_v21, %v969_v22  ;;  %v989_v53 = vmul.f32 %v1985_v28, %v1961_v9  ;;  %v990_v16 = vmul.f32 %v1985_v28, %v1963_v42 }
 0x407   : > { %v1010_v60 = vpack.c.bf16 %v988_v26, %v987_v6  ;;  %v1002_v55 = vpack.c.bf16 %v972_v41, %v971_v12  ;;  %v973_v20 = vmul.f32 %v1985_v28, %v2752_v33  ;;  %v974_v47 = vmul.f32 %v1985_v28, %v2755_v51 }
 0x408   : > { %1647 = vst [vmem:[%s2517_s23 + $0x40] sm:$0xff] %v1009_v32   ;;  %1677 = vmatprep.subr.bf16.mxu0 %v1009_v32  ;;  %1564 = vst [vmem:[%s2517_s23] sm:$0xff] %v1001_v37   ;;  %v1011_v31 = vpack.c.bf16 %v990_v16, %v989_v53  ;;  %v991_v13 = vmul.f32 %v1985_v28, %v1965_v58  ;;  %v992_v19 = vmul.f32 %v1985_v28, %v1967_v35 }
 0x409   : > { %v975_v59 = vmul.f32 %v1985_v28, %v2758_v45  ;;  %1678 = vmatpush3.bf16.msra.mxu0 %v1001_v37  ;;  %1648 = vst [vmem:[%s2517_s23 + $0x48] sm:$0xff] %v1010_v60   ;;  %1640 = vst [vmem:[%s2517_s23 + $0x8] sm:$0xff] %v1002_v55   ;;  %v1003_v40 = vpack.c.bf16 %v974_v47, %v973_v20  ;;  %v976_v9 = vmul.f32 %v1985_v28, %v2761_v57 }
 0x40a   : > { %v993_v33 = vmul.f32 %v1985_v28, %v1969_v1  ;;  %v994_v42 = vmul.f32 %v1985_v28, %v1971_v10  ;;  %1679 = vmatprep.subr.bf16.mxu0 %v1010_v60  ;;  %1649 = vst [vmem:[%s2517_s23 + $0x50] sm:$0xff] %v1011_v31   ;;  %v1012_v51 = vpack.c.bf16 %v992_v19, %v991_v13 }
 0x40b   : > { %v977_v58 = vmul.f32 %v1985_v28, %v2764_v61  ;;  %v978_v35 = vmul.f32 %v1985_v28, %v2770_v11  ;;  %v995_v36 = vmul.f32 %v1985_v28, %v1973_v43  ;;  %1641 = vst [vmem:[%s2517_s23 + $0x10] sm:$0xff] %v1003_v40   ;;  %v1004_v45 = vpack.c.bf16 %v976_v9, %v975_v59 }
 0x40c   : > { %v1013_v14 = vpack.c.bf16 %v994_v42, %v993_v33  ;;  %v996_v18 = vmul.f32 %v1985_v28, %v1975_v34  ;;  %v979_v39 = vmul.f32 %v1985_v28, %v2776_v15  ;;  %1650 = vst [vmem:[%s2517_s23 + $0x58] sm:$0xff] %v1012_v51   ;;  %v980_v1 = vmul.f32 %v1985_v28, %v2782_v48 }
 0x40d   : > { %v1005_v57 = vpack.c.bf16 %v978_v35, %v977_v58  ;;  %v997_v10 = vmul.f32 %v1985_v28, %v1977_v54  ;;  %v998_v3 = vmul.f32 %v1985_v28, %v1979_v30  ;;  %1680 = vmatpush3.bf16.msra.mxu0 %v1002_v55  ;;  %1642 = vst [vmem:[%s2517_s23 + $0x18] sm:$0xff] %v1004_v45  }
 0x40e   : > { %1651 = vst [vmem:[%s2517_s23 + $0x60] sm:$0xff] %v1013_v14   ;;  %v1014_v61 = vpack.c.bf16 %v996_v18, %v995_v36  ;;  %v981_v11 = vmul.f32 %v1985_v28, %v2788_v52  ;;  %v982_v43 = vmul.f32 %v1985_v28, %v2794_v46  ;;  %v999_v15 = vmul.f32 %v1985_v28, %v2839_v23  ;;  %v1163_v23 = vld [vmem:[#allocation3 + $0x10] sm:$0xff] }
 0x40f   : > { %1681 = vmatprep.subr.bf16.mxu0 %v1011_v31  ;;  %1643 = vst [vmem:[%s2517_s23 + $0x20] sm:$0xff] %v1005_v57   ;;  %v1006_v48 = vpack.c.bf16 %v980_v1, %v979_v39  ;;  %v1015_v34 = vpack.c.bf16 %v998_v3, %v997_v10  ;;  %v1000_v54 = vmul.f32 %v1985_v28, %v2842_v25  ;;  %v1166_v25 = vld [vmem:[#allocation3 + $0x28] sm:$0xff] }
 0x410   : > { %v983_v30 = vmul.f32 %v1985_v28, %v2800_v50  ;;  %1652 = vst [vmem:[%s2517_s23 + $0x68] sm:$0xff] %v1014_v61   ;;  %v1007_v49 = vpack.c.bf16 %v982_v43, %v981_v11  ;;  %v984_v44 = vmul.f32 %v1985_v28, %v2806_v56  ;;  %v1161_v50 = vld [vmem:[#allocation3] sm:$0xff]  ;;  %v1164_v56 = vld [vmem:[#allocation3 + $0x18] sm:$0xff] }
 0x411   : > { %1644 = vst [vmem:[%s2517_s23 + $0x28] sm:$0xff] %v1006_v48   ;;  %1653 = vst [vmem:[%s2517_s23 + $0x70] sm:$0xff] %v1015_v34   ;;  %v1016_v52 = vpack.c.bf16 %v1000_v54, %v999_v15  ;;  %1682 = vmatpush3.bf16.msra.mxu0 %v1003_v40 }
 0x412   : > { %1645 = vst [vmem:[%s2517_s23 + $0x30] sm:$0xff] %v1007_v49   ;;  %v1008_v46 = vpack.c.bf16 %v984_v44, %v983_v30  ;;  %1683 = vmatprep.subr.bf16.mxu0 %v1012_v51 }
 0x413   : > { %1654 = vst [vmem:[%s2517_s23 + $0x78] sm:$0xff] %v1016_v52  }
 0x414   : > { %1646 = vst [vmem:[%s2517_s23 + $0x38] sm:$0xff] %v1008_v46   ;;  %s2078_s23 = scalar_lea.vmem %s2077_s7, 4096 }
 0x415   : > { %1684 = vmatpush3.bf16.msra.mxu0 %v1004_v45  ;;  %p2080_p11 = scmp.lt.s32.totalorder %s2078_s23, %s2072_s12 }
 0x416   : > { %1685 = vmatprep.subr.bf16.mxu0 %v1013_v14 }
 0x417   : > { %p2081_p5 = por %p2080_p11, %p2079_p9 }
 0x419   : > { %1686 = vmatpush3.bf16.msra.mxu0 %v1005_v57  ;;  %p2082_p8 = pnand %p2081_p5, %p2075_p7 }
 0x41a   : > { %1687 = vmatprep.subr.bf16.mxu0 %v1014_v61 }
 0x41d   : > { %1688 = vmatpush3.bf16.msra.mxu0 %v1006_v48 }
 0x41e   : > { %1689 = vmatprep.subr.bf16.mxu0 %v1015_v34 }
 0x421   : > { %1690 = vmatpush3.bf16.msra.mxu0 %v1007_v49 }
 0x422   : > { %1691 = vmatprep.subr.bf16.mxu0 %v1016_v52 }
 0x425   : > { %1692 = vmatpush3.bf16.msra.mxu0 %v1008_v46 }
 0x428   : > { %1202 = vmatmul.mubr.bf16.vlgmr.msra.gmra.mrb[4].mxu0 %v1161_v50 }
 0x429   : > { %1209 = vmatprep.mubr.bf16.mxu0 %v1164_v56 }
 0x430   : > { %1210 = vmatmul.mubr.bf16.gmra.mrb[8].mxu0 %v1163_v23 }
 0x431   : > { %1217 = vmatprep.mubr.bf16.mxu0 %v1166_v25 }
 0x438   : > { %1218 = vmatmul.mubr.bf16.gmra.mrb[12].mxu0 %v1165_v24 }
 0x439   : > { %1225 = vmatprep.mubr.bf16.mxu0 %v1168_v27 }
 0x440   : > { %1226 = vmatmul.mubr.bf16.gmra.mrb[16].mxu0 %v1167_v38 }
 0x441   : > { %2085 = shalt.err (!%p2082_p8)
}
 0x442   : > { %s2086_s9 = scalar_lea.hbm %s2887_s30, 2048  ;;  %s2090_s16 = scalar_lea.hbm %s3007_s5, 8192 }
 0x443   : > { %p2087_p12 = scmp.ne.s32.totalorder %s2887_s30, %s2086_s9  ;;  %p2091_p10 = scmp.lt.u32.totalorder %s2887_s30, %s3007_s5 }
 0x444   : > { %p2092_p0 = scmp.lt.u32.totalorder %s2090_s16, %s2086_s9  ;;  %p2094_p1 = scmp.lt.u32.totalorder %s2086_s9, %s2887_s30 }
 0x445   : > { %p2088_p2 = pnand %p2087_p12, %p3044_p3 }
 0x446   : > { %p2093_p4 = por %p2092_p0, %p2091_p10 }
 0x447   : > { %p2089_p6 = pneg %p2088_p2 }
 0x448   : > { %p2095_p13 = por %p2094_p1, %p2093_p4 }
 0x44a   : > { %p2096_p7 = pnand %p2095_p13, %p2089_p6 }
 0x44c   : > { %2099 = shalt.err (!%p2096_p7)
}
 0x44d   : > { %s2243_s11 = smov 64   ;;  %s2244_s19 = smov 128  }
 0x44e   : > { %s2245_s12 = smov 4   ;;  %s1234_s4 = sld [smem:[#allocation4]] }
 0x44f   : > { %1783 = dma.vmem_to_hbm [thread:$0]  (%p3044_p3), %s2882_s15, 2048, %s2887_s30, %s1266_s6, %s2243_s11, %s2244_s19, %s2245_s12  }
 0x450   : > { %s1520_s15 = sshll.u32 %s2218_s26, 4  ;;  %s1280_s7 = sshll.u32 %s2515_s8, 4  ;;  %s2935_s7 = int_to_ptr.vmem [resolvable:$true] %s1280_s7 }
 0x451   : > { %s1277_s30 = sadd.s32 %s2214_s3, %s1520_s15  ;;  %s3045_s9 = sld [smem:[#allocation24_spill]] }
 0x452   : > { %s1521_s6 = sshll.u32 %s1277_s30, 7  ;;  %s1261_s3 = scalar_lea.sflag [#allocation7], %s2511_s27 }
 0x453   : > { %s2100_s13 = scalar_lea.vmem %s2935_s7, 1024  ;;  %s2246_s16 = smov [#allocation11]  }
 0x454   : > { %v1235_v17 = vstv %s1234_s4  ;;  %p2101_p9 = scmp.ne.s32.totalorder %s2935_s7, %s2100_s13  ;;  %s2104_s14 = sshll.u32 %s2246_s16, 4  ;;  %s2105_s14 = int_to_ptr.vmem [resolvable:$false] %s2104_s14 }
 0x455   : > { %s2106_s1 = scalar_lea.vmem %s2105_s14, 2048  ;;  %p2107_p8 = scmp.lt.s32.totalorder %s2935_s7, %s2105_s14 }
 0x456   : > { %p2102_p11 = pnand %p2101_p9, %p3044_p3  ;;  %p2108_p12 = scmp.lt.s32.totalorder %s2106_s1, %s2100_s13 }
 0x457   : > { %s2933_s17 = scalar_lea.hbm %s3045_s9, %s1521_s6 }
 0x458   : > { %p2103_p5 = pneg %p2102_p11  ;;  %p2109_p2 = por %p2108_p12, %p2107_p8 }
 0x45a   : > { %p2110_p6 = pnand %p2109_p2, %p2103_p5 }
 0x4fb   : > { %v1693_v28 = vpop.f32.mrb[4].mxu0 }
 0x4fc   : > { %v1694_v29 = vpop.f32.mrb[5].mxu0 }
 0x4fd   : > { %v1695_v22 = vadd.f32 %v1694_v29, %v1693_v28  ;;  %v1696_v21 = vpop.f32.mrb[6].mxu0 }
 0x4fe   : > { %v1697_v6 = vpop.f32.mrb[7].mxu0 }
 0x4ff   : > { %v1236_v26 = vmul.f32 %v1695_v22, %v1235_v17  ;;  %v1698_v12 = vadd.f32 %v1697_v6, %v1696_v21 }
 0x501   : > { %v1244_v41 = vadd.f32 %v1236_v26, %v2538_v62  ;;  %v1237_v32 = vmul.f32 %v1698_v12, %v1235_v17 }
 0x503   : > { %1252 = vst [vmem:[%s2515_s8] sm:$0xff] %v1244_v41  ;;  %v1245_v37 = vadd.f32 %v1237_v32, %v2540_v63  ;;  %v1699_v53 = vpop.f32.mrb[8].mxu0 }
 0x504   : > { %v1700_v16 = vpop.f32.mrb[9].mxu0 }
 0x505   : > { %1253 = vst [vmem:[%s2515_s8 + $0x8] sm:$0xff] %v1245_v37  ;;  %v1701_v60 = vadd.f32 %v1700_v16, %v1699_v53  ;;  %v1702_v55 = vpop.f32.mrb[10].mxu0 }
 0x506   : > { %v1703_v20 = vpop.f32.mrb[11].mxu0 }
 0x507   : > { %v1238_v47 = vmul.f32 %v1701_v60, %v1235_v17  ;;  %v1704_v31 = vadd.f32 %v1703_v20, %v1702_v55 }
 0x509   : > { %v1246_v13 = vadd.f32 %v1238_v47, %v2542_v0  ;;  %v1239_v19 = vmul.f32 %v1704_v31, %v1235_v17 }
 0x50b   : > { %1254 = vst [vmem:[%s2515_s8 + $0x10] sm:$0xff] %v1246_v13  ;;  %v1247_v62 = vadd.f32 %v1239_v19, %v2546_v2  ;;  %v1705_v59 = vpop.f32.mrb[12].mxu0 }
 0x50c   : > { %v1706_v63 = vpop.f32.mrb[13].mxu0 }
 0x50d   : > { %1255 = vst [vmem:[%s2515_s8 + $0x18] sm:$0xff] %v1247_v62  ;;  %v1707_v40 = vadd.f32 %v1706_v63, %v1705_v59  ;;  %v1708_v9 = vpop.f32.mrb[14].mxu0 }
 0x50e   : > { %v1709_v33 = vpop.f32.mrb[15].mxu0 }
 0x50f   : > { %v1240_v42 = vmul.f32 %v1707_v40, %v1235_v17  ;;  %v1710_v51 = vadd.f32 %v1709_v33, %v1708_v9 }
 0x511   : > { %v1248_v58 = vadd.f32 %v1240_v42, %v2550_v4  ;;  %v1241_v35 = vmul.f32 %v1710_v51, %v1235_v17 }
 0x513   : > { %1256 = vst [vmem:[%s2515_s8 + $0x20] sm:$0xff] %v1248_v58  ;;  %v1249_v0 = vadd.f32 %v1241_v35, %v2552_v5  ;;  %v1711_v2 = vpop.f32.mrb[16].mxu0 }
 0x514   : > { %v1712_v36 = vpop.f32.mrb[17].mxu0 }
 0x515   : > { %1257 = vst [vmem:[%s2515_s8 + $0x28] sm:$0xff] %v1249_v0  ;;  %v1713_v45 = vadd.f32 %v1712_v36, %v1711_v2  ;;  %v1714_v14 = vpop.f32.mrb[18].mxu0 }
 0x516   : > { %v1715_v18 = vpop.f32.mrb[19].mxu0 }
 0x517   : > { %v1242_v39 = vmul.f32 %v1713_v45, %v1235_v17  ;;  %v1716_v57 = vadd.f32 %v1715_v18, %v1714_v14 }
 0x519   : > { %v1250_v4 = vadd.f32 %v1242_v39, %v2556_v7  ;;  %v1243_v1 = vmul.f32 %v1716_v57, %v1235_v17 }
 0x51b   : > { %1258 = vst [vmem:[%s2515_s8 + $0x30] sm:$0xff] %v1250_v4  ;;  %v1251_v5 = vadd.f32 %v1243_v1, %v2558_v8 }
 0x51d   : > { %1259 = vst [vmem:[%s2515_s8 + $0x38] sm:$0xff] %v1251_v5 }
 0x51e   : > { %2113 = shalt.err (!%p2110_p6)
}
 0x51f   : > { %s2114_s8 = scalar_lea.hbm %s2933_s17, 1024  ;;  %s2118_s4 = scalar_lea.hbm %s3045_s9, 4096 }
 0x520   : > { %p2115_p10 = scmp.ne.s32.totalorder %s2933_s17, %s2114_s8  ;;  %p2119_p1 = scmp.lt.u32.totalorder %s2933_s17, %s3045_s9 }
 0x521   : > { %p2120_p13 = scmp.lt.u32.totalorder %s2118_s4, %s2114_s8  ;;  %p2122_p9 = scmp.lt.u32.totalorder %s2114_s8, %s2933_s17 }
 0x522   : > { %p2116_p0 = pnand %p2115_p10, %p3044_p3 }
 0x523   : > { %p2121_p7 = por %p2120_p13, %p2119_p1 }
 0x524   : > { %p2117_p4 = pneg %p2116_p0 }
 0x525   : > { %p2123_p11 = por %p2122_p9, %p2121_p7 }
 0x527   : > { %p2124_p5 = pnand %p2123_p11, %p2117_p4 }
 0x529   : > { %2127 = shalt.err (!%p2124_p5)
}
 0x52a   : > { %s2247_s6 = smov 256   ;;  %s2248_s26 = smov 8  }
 0x52b   : > { %1782 = dma.vmem_to_hbm [thread:$0]  (%p3044_p3), %s2935_s7, 1024, %s2933_s17, %s1261_s3, %s2244_s19, %s2247_s6, %s2248_s26  }
 0x52c PF: > { %s3046_s23 = sld [smem:[#allocation18_spill]]  ;;  %s3047_s13 = sld [smem:[#allocation20_spill]] }
 0x52d   : > { %p1809_p8 = scmp.ge.s32.totalorder %s2230_s29, 2 }
 0x532   : > { %s1312_s16 = sand.u32 1, %s3046_s23   ;;  %p3048_p12 = scmp.ne.s32.totalorder %s3047_s13, 0 }
 0x533   : > { %s1313_s14 = scalar_lea.sflag [#allocation7], %s1312_s16 }
 0x534   : > { %p1798_p2 = pnand %p1809_p8, %p3048_p12 }
 0x536   : > { %2181 = dma.done.wait (!%p1798_p2), %s1313_s14, 1024  }
 0x537   : > { %2183 = vsyncadd (!%p1798_p2), %s1313_s14, 4294966272  ;;  %s1322_s1 = scalar_lea.sflag [#allocation13], %s1312_s16 }
 0x538   : > { %2185 = dma.done.wait (!%p1798_p2), %s1322_s1, 2048  }
 0x539   : > { %2187 = vsyncadd (!%p1798_p2), %s1322_s1, 4294965248  ;;  %s27_s29 = sadd.s32 1, %s2230_s29   ;;  %s3049_s10 = smov %s2452_s20 }
 0x53a   : > { %p24_p6 = scmp.ge.s32.totalorder %s27_s29, 6   ;;  %s3050_s3 = sld [smem:[#allocation19_spill]] }
 0x53b   : > { %s3051_s27 = sld [smem:[#allocation21_spill]]  ;;  %s3052_s20 = smov %s2194_s21 }
 0x53c   : > { %s3053_s21 = smov %s2198_s22  ;;  %s3054_s22 = smov %s2457_s2 }
 0x53d   : > { %s3055_s23 = smov %s2206_s24  ;;  %s3056_s24 = smov %s2210_s25 }
 0x53e   : > { %s3057_s25 = smov %s3049_s10  ;;  %s3058_s26 = smov %s2226_s28 }
 0x53f   : > { %s3059_s28 = smov %s3065_s18  ;;  %26 = sbr.rel (!%p24_p6) target bundleno = 17 (0x11), region = 111 }
 0x546   :  { %1327 = vsyncpa [#allocation6], 1 }
 0x547   :  { %1329 = vsyncpa [#allocation6 + $0x1], 1 }
 0x548   :  { %1330 = vsyncpa [#allocation9], 1 }
 0x549   :  { %1331 = vsyncpa [#allocation7], 1 }
 0x54a   :  { %1333 = vsyncpa [#allocation7 + $0x1], 1 }
 0x54b   :  { %1334 = vsyncpa [#allocation13], 1 }
 0x54c   :  { %1336 = vsyncpa [#allocation13 + $0x1], 1 }

</bundles_post_ra>
